<compile_context>
chip_gen: v5e
topology: v5e:2x2
jax: 0.10.0
libtpu: 0.0.40
codegen_flags: <defaults>
</compile_context>

<pallas_src>
import functools
import math

import jax
import jax.numpy as jnp
import numpy as np
from jax import lax
from jax.experimental import pallas as pl
from jax.experimental.pallas import tpu as pltpu


# ----------------------------- Pallas kernel -------------------------------


def _pde_rnn_kernel(
    # inputs (resident in VMEM, constant across the grid)
    x_ref, w0_ref, w1_ref, b_ref, fcw_ref, fcb_ref,
    # output: (n_groups, B, group*O) slab per grid step (lane-dense last dim)
    out_ref,
    # scratch carried across grid steps (time chunks)
    h0_s, h1_s, x_s,
    *, in_dim, hidden_dim, group,
):
    c = pl.program_id(0)

    @pl.when(c == 0)
    def _():
        h0_s[...] = jnp.zeros_like(h0_s)
        h1_s[...] = jnp.zeros_like(h1_s)
        x_s[...] = x_ref[...]

    H = hidden_dim
    B = h0_s.shape[0]
    G = 4 * H
    n_groups = out_ref.shape[0]
    O = fcw_ref.shape[1]

    # --- loop-invariant loads / broadcasts, hoisted out of the time loop ---
    w0x = w0_ref[0:in_dim, :]             # (in, 4H)  [Wir | Wiz | Win |  0 ]
    w0h = w0_ref[in_dim:in_dim + H, :]    # (H , 4H)  [Whr | Whz |  0  | Whn]
    w1x = w1_ref[0:H, :]
    w1h = w1_ref[H:2 * H, :]
    b0 = jnp.broadcast_to(b_ref[0:1, :], (B, G))              # f32
    b1 = jnp.broadcast_to(b_ref[1:2, :], (B, G))              # f32
    fcw = fcw_ref[...]                                        # (H, O) bf16
    fcb = jnp.broadcast_to(fcb_ref[...], (B, O))              # f32

    def gru(x, h, wx, wh, b):
        # two lane-dense matmuls -> (B, 4H) f32 gate pre-activations
        g = (
            jnp.dot(x.astype(wx.dtype), wx, preferred_element_type=jnp.float32)
            + jnp.dot(h.astype(wh.dtype), wh, preferred_element_type=jnp.float32)
            + b
        )
        # single EUP push covers both r and z (one vreg at B=2, 4H=128)
        rz = jax.nn.sigmoid(g[:, 0:2 * H])
        r = rz[:, 0:H]
        z = rz[:, H:2 * H]
        n = jnp.tanh(g[:, 2 * H:3 * H] + r * g[:, 3 * H:4 * H])
        return (1.0 - z) * n + z * h

    def step(inp, h0, h1):
        h0 = gru(inp, h0, w0x, w0h, b0)
        h1 = gru(h0, h1, w1x, w1h, b1)
        out = (
            jnp.dot(h1.astype(fcw.dtype), fcw,
                    preferred_element_type=jnp.float32)
            + fcb
        )
        return out, h0, h1                # fc output feeds back as next input

    def group_body(g_idx, carry):
        inp, h0, h1 = carry
        outs = []
        for _ in range(group):            # fully unrolled (static) inner loop
            inp, h0, h1 = step(inp, h0, h1)
            outs.append(inp)
        # one lane-dense (B, group*O) store per `group` time steps
        out_ref[g_idx] = jnp.concatenate(outs, axis=-1)
        return inp, h0, h1

    carry0 = (x_s[...], h0_s[...], h1_s[...])
    inp, h0, h1 = lax.fori_loop(0, n_groups, group_body, carry0)

    # persist the recurrence state for the next time chunk
    x_s[...] = inp
    h0_s[...] = h0
    h1_s[...] = h1


# ------------------------------ JAX wrapper --------------------------------


def make_params(key, input_dim, hidden_dim, output_dim, num_layers=2):
    """Deterministic PyTorch-style init: U(-1/sqrt(H), 1/sqrt(H)).

    Returns raw (f32, gate-split, pre-transposed) parameters.
    """
    assert num_layers == 2, "kernel is written for num_layers == 2"
    scale = 1.0 / np.sqrt(hidden_dim)

    def uni(k, shape):
        return jax.random.uniform(k, shape, jnp.float32, -scale, scale)

    keys = iter(jax.random.split(key, 32))
    raw = []
    for layer in range(num_layers):
        in_dim = input_dim if layer == 0 else hidden_dim
        raw.append(dict(
            wir=uni(next(keys), (in_dim, hidden_dim)),
            wiz=uni(next(keys), (in_dim, hidden_dim)),
            win=uni(next(keys), (in_dim, hidden_dim)),
            whr=uni(next(keys), (hidden_dim, hidden_dim)),
            whz=uni(next(keys), (hidden_dim, hidden_dim)),
            whn=uni(next(keys), (hidden_dim, hidden_dim)),
            bir=uni(next(keys), (1, hidden_dim)),
            biz=uni(next(keys), (1, hidden_dim)),
            bin=uni(next(keys), (1, hidden_dim)),
            bhr=uni(next(keys), (1, hidden_dim)),
            bhz=uni(next(keys), (1, hidden_dim)),
            bhn=uni(next(keys), (1, hidden_dim)),
        ))
    fcw = uni(next(keys), (hidden_dim, output_dim))
    fcb = uni(next(keys), (1, output_dim))
    return raw, fcw, fcb


def pack_params(raw, fcw, fcb, weight_dtype=jnp.bfloat16):
    """Pack 22 raw arrays into 5 kernel inputs (weights in bf16, biases f32)."""
    packed_w = []
    packed_b = []
    for p in raw:
        in_dim, H = p["wir"].shape
        zx = jnp.zeros((in_dim, H), jnp.float32)
        zh = jnp.zeros((H, H), jnp.float32)
        wx = jnp.concatenate([p["wir"], p["wiz"], p["win"], zx], axis=1)
        wh = jnp.concatenate([p["whr"], p["whz"], zh, p["whn"]], axis=1)
        packed_w.append(jnp.concatenate([wx, wh], axis=0).astype(weight_dtype))
        # b_ir+b_hr and b_iz+b_hz fold; b_in / b_hn must stay separate.
        packed_b.append(jnp.concatenate(
            [p["bir"] + p["bhr"], p["biz"] + p["bhz"], p["bin"], p["bhn"]],
            axis=1))
    bias = jnp.concatenate(packed_b, axis=0)            # (num_layers, 4H) f32
    return (packed_w[0], packed_w[1], bias, fcw.astype(weight_dtype), fcb)


def _plan_time(time_size, output_dim, max_chunk=512, max_group=16):
    """Pick (group, chunk, num_chunks).

    group : time steps whose outputs are concatenated into one lane-dense row
            (group*O is a multiple of 128 when O divides 128 cleanly).
    chunk : time steps per grid iteration (multiple of group, <= ~max_chunk).
    Works for any time_size (no exact-divisor requirement); the tail of the
    last chunk is computed and discarded by the wrapper.
    """
    group = 128 // math.gcd(128, output_dim)
    group = min(group, max_group)
    chunk = group * max(1, pl.cdiv(min(time_size, max_chunk), group))
    num_chunks = pl.cdiv(time_size, chunk)
    return group, chunk, num_chunks


@functools.partial(jax.jit, static_argnames=("time_size",))
def pde_rnn_forward(x, packed, time_size):
    """x: (B, 1, input_dim) float32 -> (time_size, B, 1, output_dim) float32."""
    w0, w1, bias, fcw, fcb = packed
    B, S, input_dim = x.shape
    assert S == 1, "autoregressive rollout assumes seq_len == 1"
    hidden_dim = w1.shape[0] // 2
    output_dim = fcw.shape[1]
    assert w0.shape[0] == input_dim + hidden_dim
    assert input_dim == output_dim, (
        "non-spectral rollout feeds fc output back as GRU input")

    group, chunk, num_chunks = _plan_time(time_size, output_dim)
    n_groups = chunk // group
    total_groups = num_chunks * n_groups
    lane_w = group * output_dim          # lane-dense output row width

    x2d = x.reshape(B, input_dim)
    inputs = [x2d, w0, w1, bias, fcw, fcb]

    def full_spec(arr):
        nd = arr.ndim
        # NOTE(v7x @ large H): add pipeline_mode=pl.Buffered(1) here to stop
        # double-buffering these grid-invariant weights, and set
        # vmem_limit_bytes in CompilerParams.
        return pl.BlockSpec(arr.shape, lambda c, _nd=nd: (0,) * _nd)

    kernel = functools.partial(
        _pde_rnn_kernel, in_dim=input_dim, hidden_dim=hidden_dim, group=group)

    out = pl.pallas_call(
        kernel,
        out_shape=jax.ShapeDtypeStruct((total_groups, B, lane_w), jnp.float32),
        grid_spec=pltpu.PrefetchScalarGridSpec(
            num_scalar_prefetch=0,
            grid=(num_chunks,),
            in_specs=[full_spec(a) for a in inputs],
            out_specs=pl.BlockSpec((n_groups, B, lane_w),
                                   lambda c: (c, 0, 0)),
            scratch_shapes=[
                pltpu.VMEM((B, hidden_dim), jnp.float32),   # h layer 0
                pltpu.VMEM((B, hidden_dim), jnp.float32),   # h layer 1
                pltpu.VMEM((B, input_dim), jnp.float32),    # carried input
            ],
        ),
        compiler_params=pltpu.CompilerParams(
            # time recurrence: MUST stay sequential ("arbitrary")
            dimension_semantics=("arbitrary",)),
    )(*inputs)

    # (total_groups, B, group*O) -> (time, B, 1, O): pure layout plumbing.
    out = out.reshape(total_groups, B, group, output_dim)
    out = out.transpose(0, 2, 1, 3)                       # (groups, group, B, O)
    out = out.reshape(total_groups * group, B, output_dim)[:time_size]
    return out.reshape(time_size, B, 1, output_dim)


# --------------------------- pure-JAX reference -----------------------------


def pde_rnn_reference(x, raw, fcw, fcb, time_size, weight_dtype=jnp.bfloat16):
    """PyTorch-semantics reference (spectral=False, biDir=False) computed with
    the same mixed precision as the kernel: bf16 weights / operands, f32
    accumulation, f32 state & biases.

    NOTE: this validates the Pallas kernel against identical bf16/f32 math,
    not against a true f32 PyTorch baseline; for long autoregressive rollouts
    bf16-weight error compounds — confirm acceptability vs. the f32 model.
    """
    B = x.shape[0]
    H = raw[0]["whr"].shape[0]

    def dot(a, w):
        return jnp.dot(a.astype(weight_dtype), w.astype(weight_dtype),
                       preferred_element_type=jnp.float32)

    def cell(inp, h, p):
        r = jax.nn.sigmoid(dot(inp, p["wir"]) + dot(h, p["whr"])
                           + (p["bir"] + p["bhr"]))
        z = jax.nn.sigmoid(dot(inp, p["wiz"]) + dot(h, p["whz"])
                           + (p["biz"] + p["bhz"]))
        n = jnp.tanh(dot(inp, p["win"]) + p["bin"]
                     + r * (dot(h, p["whn"]) + p["bhn"]))
        return (1.0 - z) * n + z * h

    h0 = jnp.zeros((B, H), jnp.float32)
    h1 = jnp.zeros((B, H), jnp.float32)
    inp = x[:, 0, :]
    outs = []
    for _ in range(time_size):
        h0 = cell(inp, h0, raw[0])
        h1 = cell(h0, h1, raw[1])
        out = dot(h1, fcw) + fcb
        outs.append(out)
        inp = out
    return jnp.stack(outs, axis=0)[:, :, None, :]


# --------------------------------- main -------------------------------------


if __name__ == "__main__":
    # Small shapes consistent with the module's forward (seq_len must be 1,
    # and output_dim == input_dim for the non-spectral autoregressive loop).
    batch = 2
    input_dim = 16
    hidden_dim = 32      # 4H = 128 -> lane-dense fused gate matmuls
    output_dim = 16
    num_layers = 2
    time_size = 8        # group = 8 -> one lane-dense (B, 128) output row

    key = jax.random.PRNGKey(0)
    kx, kp = jax.random.split(key)
    x = jax.random.normal(kx, (batch, 1, input_dim), jnp.float32)
    raw, fcw, fcb = make_params(kp, input_dim, hidden_dim, output_dim,
                                num_layers)
    packed = pack_params(raw, fcw, fcb)

    out = pde_rnn_forward(x, packed, time_size)
    out = jax.block_until_ready(out)

    # Tolerance accounts only for ULP-level differences between the Pallas and
    # XLA paths (identical bf16/f32 math on both sides).
    ref = pde_rnn_reference(x, raw, fcw, fcb, time_size)
    np.testing.assert_allclose(np.asarray(out), np.asarray(ref),
                               rtol=1e-3, atol=1e-3)
    assert out.shape == (time_size, batch, 1, output_dim)
    print("KERNEL_OK")
</pallas_src>

<mosaic_0001>
module attributes {stable_mosaic.version = 11 : i64} {
  func.func @_pde_rnn_kernel(%arg0: i32, %arg1: memref<2x16xf32, #tpu.memory_space<vmem>>, %arg2: memref<48x128xbf16, #tpu.memory_space<vmem>>, %arg3: memref<64x128xbf16, #tpu.memory_space<vmem>>, %arg4: memref<2x128xf32, #tpu.memory_space<vmem>>, %arg5: memref<32x16xbf16, #tpu.memory_space<vmem>>, %arg6: memref<1x16xf32, #tpu.memory_space<vmem>>, %arg7: memref<1x2x128xf32, #tpu.memory_space<vmem>>, %arg8: memref<2x32xf32, #tpu.memory_space<vmem>>, %arg9: memref<2x32xf32, #tpu.memory_space<vmem>>, %arg10: memref<2x16xf32, #tpu.memory_space<vmem>>) attributes {dimension_semantics = [#tpu.dimension_semantics<arbitrary>], iteration_bounds = array<i64: 1>, scalar_prefetch = 0 : i64, scratch_operands = 3 : i64, tpu.core_type = #tpu.core_type<tc>, window_params = [{pipeline_mode = #tpu.pipeline_mode<synchronous>, transform_indices = @transform_0, window_bounds = array<i64: 2, 16>}, {pipeline_mode = #tpu.pipeline_mode<synchronous>, transform_indices = @transform_1, window_bounds = array<i64: 48, 128>}, {pipeline_mode = #tpu.pipeline_mode<synchronous>, transform_indices = @transform_2, window_bounds = array<i64: 64, 128>}, {pipeline_mode = #tpu.pipeline_mode<synchronous>, transform_indices = @transform_3, window_bounds = array<i64: 2, 128>}, {pipeline_mode = #tpu.pipeline_mode<synchronous>, transform_indices = @transform_4, window_bounds = array<i64: 32, 16>}, {pipeline_mode = #tpu.pipeline_mode<synchronous>, transform_indices = @transform_5, window_bounds = array<i64: 1, 16>}, {transform_indices = @transform_6, window_bounds = array<i64: 1, 2, 128>}]} {
    %c0_i32 = arith.constant 0 : i32
    %0 = arith.cmpi eq, %arg0, %c0_i32 : i32
    %1 = arith.extui %0 : i1 to i32
    %c0_i32_0 = arith.constant 0 : i32
    %2 = arith.cmpi ne, %1, %c0_i32_0 : i32
    scf.if %2 {
      %cst_99 = arith.constant 0.000000e+00 : f32
      %436 = vector.broadcast %cst_99 : f32 to vector<2x32xf32>
      %c0_100 = arith.constant 0 : index
      %c0_101 = arith.constant 0 : index
      %437 = vector.load %arg8[%c0_100, %c0_101] : memref<2x32xf32, #tpu.memory_space<vmem>>, vector<2x32xf32>
      tpu.vector_store %arg8[%c0_100, %c0_101], %436 {strides = array<i32>} : memref<2x32xf32, #tpu.memory_space<vmem>>, vector<2x32xf32>,
      %cst_102 = arith.constant 0.000000e+00 : f32
      %438 = vector.broadcast %cst_102 : f32 to vector<2x32xf32>
      %c0_103 = arith.constant 0 : index
      %c0_104 = arith.constant 0 : index
      %439 = vector.load %arg9[%c0_103, %c0_104] : memref<2x32xf32, #tpu.memory_space<vmem>>, vector<2x32xf32>
      tpu.vector_store %arg9[%c0_103, %c0_104], %438 {strides = array<i32>} : memref<2x32xf32, #tpu.memory_space<vmem>>, vector<2x32xf32>,
      %c0_105 = arith.constant 0 : index
      %c0_106 = arith.constant 0 : index
      %440 = vector.load %arg1[%c0_105, %c0_106] : memref<2x16xf32, #tpu.memory_space<vmem>>, vector<2x16xf32>
      %c0_107 = arith.constant 0 : index
      %c0_108 = arith.constant 0 : index
      %441 = vector.load %arg10[%c0_107, %c0_108] : memref<2x16xf32, #tpu.memory_space<vmem>>, vector<2x16xf32>
      tpu.vector_store %arg10[%c0_107, %c0_108], %440 {strides = array<i32>} : memref<2x16xf32, #tpu.memory_space<vmem>>, vector<2x16xf32>,
    } else {
    }
    %c0 = arith.constant 0 : index
    %c0_1 = arith.constant 0 : index
    %3 = vector.load %arg2[%c0, %c0_1] : memref<48x128xbf16, #tpu.memory_space<vmem>>, vector<16x128xbf16>
    %c16 = arith.constant 16 : index
    %c0_2 = arith.constant 0 : index
    %4 = vector.load %arg2[%c16, %c0_2] : memref<48x128xbf16, #tpu.memory_space<vmem>>, vector<32x128xbf16>
    %c0_3 = arith.constant 0 : index
    %c0_4 = arith.constant 0 : index
    %5 = vector.load %arg3[%c0_3, %c0_4] : memref<64x128xbf16, #tpu.memory_space<vmem>>, vector<32x128xbf16>
    %c32 = arith.constant 32 : index
    %c0_5 = arith.constant 0 : index
    %6 = vector.load %arg3[%c32, %c0_5] : memref<64x128xbf16, #tpu.memory_space<vmem>>, vector<32x128xbf16>
    %c0_6 = arith.constant 0 : index
    %c0_7 = arith.constant 0 : index
    %7 = vector.load %arg4[%c0_6, %c0_7] : memref<2x128xf32, #tpu.memory_space<vmem>>, vector<1x128xf32>
    %8 = vector.shape_cast %7 : vector<1x128xf32> to vector<1x128xf32>
    %9 = vector.broadcast %8 : vector<1x128xf32> to vector<2x128xf32>
    %c1 = arith.constant 1 : index
    %c0_8 = arith.constant 0 : index
    %10 = vector.load %arg4[%c1, %c0_8] : memref<2x128xf32, #tpu.memory_space<vmem>>, vector<1x128xf32>
    %11 = vector.shape_cast %10 : vector<1x128xf32> to vector<1x128xf32>
    %12 = vector.broadcast %11 : vector<1x128xf32> to vector<2x128xf32>
    %c0_9 = arith.constant 0 : index
    %c0_10 = arith.constant 0 : index
    %13 = vector.load %arg5[%c0_9, %c0_10] : memref<32x16xbf16, #tpu.memory_space<vmem>>, vector<32x16xbf16>
    %c0_11 = arith.constant 0 : index
    %c0_12 = arith.constant 0 : index
    %14 = vector.load %arg6[%c0_11, %c0_12] : memref<1x16xf32, #tpu.memory_space<vmem>>, vector<1x16xf32>
    %15 = vector.shape_cast %14 : vector<1x16xf32> to vector<1x16xf32>
    %16 = vector.broadcast %15 : vector<1x16xf32> to vector<2x16xf32>
    %c0_13 = arith.constant 0 : index
    %c0_14 = arith.constant 0 : index
    %17 = vector.load %arg10[%c0_13, %c0_14] : memref<2x16xf32, #tpu.memory_space<vmem>>, vector<2x16xf32>
    %c0_15 = arith.constant 0 : index
    %c0_16 = arith.constant 0 : index
    %18 = vector.load %arg8[%c0_15, %c0_16] : memref<2x32xf32, #tpu.memory_space<vmem>>, vector<2x32xf32>
    %c0_17 = arith.constant 0 : index
    %c0_18 = arith.constant 0 : index
    %19 = vector.load %arg9[%c0_17, %c0_18] : memref<2x32xf32, #tpu.memory_space<vmem>>, vector<2x32xf32>
    %c0_i32_19 = arith.constant 0 : i32
    %20 = arith.truncf %17 : vector<2x16xf32> to vector<2x16xbf16>
    %cst = arith.constant dense<0.000000e+00> : vector<2x128xf32>
    %21 = tpu.matmul %20, %3, %cst {dimension_numbers = #tpu.dot_dimension_numbers<[1], [0], [0], [1], [0, 0, 1, 1], [], []>} : vector<2x16xbf16>, vector<16x128xbf16>, vector<2x128xf32> -> vector<2x128xf32>
    %22 = arith.truncf %18 : vector<2x32xf32> to vector<2x32xbf16>
    %cst_20 = arith.constant dense<0.000000e+00> : vector<2x128xf32>
    %23 = tpu.matmul %22, %4, %cst_20 {dimension_numbers = #tpu.dot_dimension_numbers<[1], [0], [0], [1], [0, 0, 1, 1], [], []>} : vector<2x32xbf16>, vector<32x128xbf16>, vector<2x128xf32> -> vector<2x128xf32>
    %24 = arith.addf %21, %23 : vector<2x128xf32>
    %25 = arith.addf %24, %9 : vector<2x128xf32>
    %26 = vector.extract_strided_slice %25 {offsets = [0, 0], sizes = [2, 64], strides = [1, 1]} : vector<2x128xf32> to vector<2x64xf32>
    %27 = arith.negf %26 : vector<2x64xf32>
    %28 = math.exp %27 : vector<2x64xf32>
    %cst_21 = arith.constant 1.000000e+00 : f32
    %29 = vector.broadcast %cst_21 : f32 to vector<2x64xf32>
    %30 = arith.addf %29, %28 : vector<2x64xf32>
    %31 = arith.divf %29, %30 : vector<2x64xf32>
    %32 = vector.extract_strided_slice %31 {offsets = [0, 0], sizes = [2, 32], strides = [1, 1]} : vector<2x64xf32> to vector<2x32xf32>
    %33 = vector.extract_strided_slice %31 {offsets = [0, 32], sizes = [2, 32], strides = [1, 1]} : vector<2x64xf32> to vector<2x32xf32>
    %34 = vector.extract_strided_slice %25 {offsets = [0, 64], sizes = [2, 32], strides = [1, 1]} : vector<2x128xf32> to vector<2x32xf32>
    %35 = vector.extract_strided_slice %25 {offsets = [0, 96], sizes = [2, 32], strides = [1, 1]} : vector<2x128xf32> to vector<2x32xf32>
    %36 = arith.mulf %32, %35 : vector<2x32xf32>
    %37 = arith.addf %34, %36 : vector<2x32xf32>
    %38 = math.tanh %37 : vector<2x32xf32>
    %cst_22 = arith.constant 1.000000e+00 : f32
    %39 = vector.broadcast %cst_22 : f32 to vector<2x32xf32>
    %40 = arith.subf %39, %33 : vector<2x32xf32>
    %41 = arith.mulf %40, %38 : vector<2x32xf32>
    %42 = arith.mulf %33, %18 : vector<2x32xf32>
    %43 = arith.addf %41, %42 : vector<2x32xf32>
    %44 = arith.truncf %43 : vector<2x32xf32> to vector<2x32xbf16>
    %cst_23 = arith.constant dense<0.000000e+00> : vector<2x128xf32>
    %45 = tpu.matmul %44, %5, %cst_23 {dimension_numbers = #tpu.dot_dimension_numbers<[1], [0], [0], [1], [0, 0, 1, 1], [], []>} : vector<2x32xbf16>, vector<32x128xbf16>, vector<2x128xf32> -> vector<2x128xf32>
    %46 = arith.truncf %19 : vector<2x32xf32> to vector<2x32xbf16>
    %cst_24 = arith.constant dense<0.000000e+00> : vector<2x128xf32>
    %47 = tpu.matmul %46, %6, %cst_24 {dimension_numbers = #tpu.dot_dimension_numbers<[1], [0], [0], [1], [0, 0, 1, 1], [], []>} : vector<2x32xbf16>, vector<32x128xbf16>, vector<2x128xf32> -> vector<2x128xf32>
    %48 = arith.addf %45, %47 : vector<2x128xf32>
    %49 = arith.addf %48, %12 : vector<2x128xf32>
    %50 = vector.extract_strided_slice %49 {offsets = [0, 0], sizes = [2, 64], strides = [1, 1]} : vector<2x128xf32> to vector<2x64xf32>
    %51 = arith.negf %50 : vector<2x64xf32>
    %52 = math.exp %51 : vector<2x64xf32>
    %cst_25 = arith.constant 1.000000e+00 : f32
    %53 = vector.broadcast %cst_25 : f32 to vector<2x64xf32>
    %54 = arith.addf %53, %52 : vector<2x64xf32>
    %55 = arith.divf %53, %54 : vector<2x64xf32>
    %56 = vector.extract_strided_slice %55 {offsets = [0, 0], sizes = [2, 32], strides = [1, 1]} : vector<2x64xf32> to vector<2x32xf32>
    %57 = vector.extract_strided_slice %55 {offsets = [0, 32], sizes = [2, 32], strides = [1, 1]} : vector<2x64xf32> to vector<2x32xf32>
    %58 = vector.extract_strided_slice %49 {offsets = [0, 64], sizes = [2, 32], strides = [1, 1]} : vector<2x128xf32> to vector<2x32xf32>
    %59 = vector.extract_strided_slice %49 {offsets = [0, 96], sizes = [2, 32], strides = [1, 1]} : vector<2x128xf32> to vector<2x32xf32>
    %60 = arith.mulf %56, %59 : vector<2x32xf32>
    %61 = arith.addf %58, %60 : vector<2x32xf32>
    %62 = math.tanh %61 : vector<2x32xf32>
    %cst_26 = arith.constant 1.000000e+00 : f32
    %63 = vector.broadcast %cst_26 : f32 to vector<2x32xf32>
    %64 = arith.subf %63, %57 : vector<2x32xf32>
    %65 = arith.mulf %64, %62 : vector<2x32xf32>
    %66 = arith.mulf %57, %19 : vector<2x32xf32>
    %67 = arith.addf %65, %66 : vector<2x32xf32>
    %68 = arith.truncf %67 : vector<2x32xf32> to vector<2x32xbf16>
    %cst_27 = arith.constant dense<0.000000e+00> : vector<2x16xf32>
    %69 = tpu.matmul %68, %13, %cst_27 {dimension_numbers = #tpu.dot_dimension_numbers<[1], [0], [0], [1], [0, 0, 1, 1], [], []>} : vector<2x32xbf16>, vector<32x16xbf16>, vector<2x16xf32> -> vector<2x16xf32>
    %70 = arith.addf %69, %16 : vector<2x16xf32>
    %71 = arith.truncf %70 : vector<2x16xf32> to vector<2x16xbf16>
    %cst_28 = arith.constant dense<0.000000e+00> : vector<2x128xf32>
    %72 = tpu.matmul %71, %3, %cst_28 {dimension_numbers = #tpu.dot_dimension_numbers<[1], [0], [0], [1], [0, 0, 1, 1], [], []>} : vector<2x16xbf16>, vector<16x128xbf16>, vector<2x128xf32> -> vector<2x128xf32>
    %73 = arith.truncf %43 : vector<2x32xf32> to vector<2x32xbf16>
    %cst_29 = arith.constant dense<0.000000e+00> : vector<2x128xf32>
    %74 = tpu.matmul %73, %4, %cst_29 {dimension_numbers = #tpu.dot_dimension_numbers<[1], [0], [0], [1], [0, 0, 1, 1], [], []>} : vector<2x32xbf16>, vector<32x128xbf16>, vector<2x128xf32> -> vector<2x128xf32>
    %75 = arith.addf %72, %74 : vector<2x128xf32>
    %76 = arith.addf %75, %9 : vector<2x128xf32>
    %77 = vector.extract_strided_slice %76 {offsets = [0, 0], sizes = [2, 64], strides = [1, 1]} : vector<2x128xf32> to vector<2x64xf32>
    %78 = arith.negf %77 : vector<2x64xf32>
    %79 = math.exp %78 : vector<2x64xf32>
    %cst_30 = arith.constant 1.000000e+00 : f32
    %80 = vector.broadcast %cst_30 : f32 to vector<2x64xf32>
    %81 = arith.addf %80, %79 : vector<2x64xf32>
    %82 = arith.divf %80, %81 : vector<2x64xf32>
    %83 = vector.extract_strided_slice %82 {offsets = [0, 0], sizes = [2, 32], strides = [1, 1]} : vector<2x64xf32> to vector<2x32xf32>
    %84 = vector.extract_strided_slice %82 {offsets = [0, 32], sizes = [2, 32], strides = [1, 1]} : vector<2x64xf32> to vector<2x32xf32>
    %85 = vector.extract_strided_slice %76 {offsets = [0, 64], sizes = [2, 32], strides = [1, 1]} : vector<2x128xf32> to vector<2x32xf32>
    %86 = vector.extract_strided_slice %76 {offsets = [0, 96], sizes = [2, 32], strides = [1, 1]} : vector<2x128xf32> to vector<2x32xf32>
    %87 = arith.mulf %83, %86 : vector<2x32xf32>
    %88 = arith.addf %85, %87 : vector<2x32xf32>
    %89 = math.tanh %88 : vector<2x32xf32>
    %cst_31 = arith.constant 1.000000e+00 : f32
    %90 = vector.broadcast %cst_31 : f32 to vector<2x32xf32>
    %91 = arith.subf %90, %84 : vector<2x32xf32>
    %92 = arith.mulf %91, %89 : vector<2x32xf32>
    %93 = arith.mulf %84, %43 : vector<2x32xf32>
    %94 = arith.addf %92, %93 : vector<2x32xf32>
    %95 = arith.truncf %94 : vector<2x32xf32> to vector<2x32xbf16>
    %cst_32 = arith.constant dense<0.000000e+00> : vector<2x128xf32>
    %96 = tpu.matmul %95, %5, %cst_32 {dimension_numbers = #tpu.dot_dimension_numbers<[1], [0], [0], [1], [0, 0, 1, 1], [], []>} : vector<2x32xbf16>, vector<32x128xbf16>, vector<2x128xf32> -> vector<2x128xf32>
    %97 = arith.truncf %67 : vector<2x32xf32> to vector<2x32xbf16>
    %cst_33 = arith.constant dense<0.000000e+00> : vector<2x128xf32>
    %98 = tpu.matmul %97, %6, %cst_33 {dimension_numbers = #tpu.dot_dimension_numbers<[1], [0], [0], [1], [0, 0, 1, 1], [], []>} : vector<2x32xbf16>, vector<32x128xbf16>, vector<2x128xf32> -> vector<2x128xf32>
    %99 = arith.addf %96, %98 : vector<2x128xf32>
    %100 = arith.addf %99, %12 : vector<2x128xf32>
    %101 = vector.extract_strided_slice %100 {offsets = [0, 0], sizes = [2, 64], strides = [1, 1]} : vector<2x128xf32> to vector<2x64xf32>
    %102 = arith.negf %101 : vector<2x64xf32>
    %103 = math.exp %102 : vector<2x64xf32>
    %cst_34 = arith.constant 1.000000e+00 : f32
    %104 = vector.broadcast %cst_34 : f32 to vector<2x64xf32>
    %105 = arith.addf %104, %103 : vector<2x64xf32>
    %106 = arith.divf %104, %105 : vector<2x64xf32>
    %107 = vector.extract_strided_slice %106 {offsets = [0, 0], sizes = [2, 32], strides = [1, 1]} : vector<2x64xf32> to vector<2x32xf32>
    %108 = vector.extract_strided_slice %106 {offsets = [0, 32], sizes = [2, 32], strides = [1, 1]} : vector<2x64xf32> to vector<2x32xf32>
    %109 = vector.extract_strided_slice %100 {offsets = [0, 64], sizes = [2, 32], strides = [1, 1]} : vector<2x128xf32> to vector<2x32xf32>
    %110 = vector.extract_strided_slice %100 {offsets = [0, 96], sizes = [2, 32], strides = [1, 1]} : vector<2x128xf32> to vector<2x32xf32>
    %111 = arith.mulf %107, %110 : vector<2x32xf32>
    %112 = arith.addf %109, %111 : vector<2x32xf32>
    %113 = math.tanh %112 : vector<2x32xf32>
    %cst_35 = arith.constant 1.000000e+00 : f32
    %114 = vector.broadcast %cst_35 : f32 to vector<2x32xf32>
    %115 = arith.subf %114, %108 : vector<2x32xf32>
    %116 = arith.mulf %115, %113 : vector<2x32xf32>
    %117 = arith.mulf %108, %67 : vector<2x32xf32>
    %118 = arith.addf %116, %117 : vector<2x32xf32>
    %119 = arith.truncf %118 : vector<2x32xf32> to vector<2x32xbf16>
    %cst_36 = arith.constant dense<0.000000e+00> : vector<2x16xf32>
    %120 = tpu.matmul %119, %13, %cst_36 {dimension_numbers = #tpu.dot_dimension_numbers<[1], [0], [0], [1], [0, 0, 1, 1], [], []>} : vector<2x32xbf16>, vector<32x16xbf16>, vector<2x16xf32> -> vector<2x16xf32>
    %121 = arith.addf %120, %16 : vector<2x16xf32>
    %122 = arith.truncf %121 : vector<2x16xf32> to vector<2x16xbf16>
    %cst_37 = arith.constant dense<0.000000e+00> : vector<2x128xf32>
    %123 = tpu.matmul %122, %3, %cst_37 {dimension_numbers = #tpu.dot_dimension_numbers<[1], [0], [0], [1], [0, 0, 1, 1], [], []>} : vector<2x16xbf16>, vector<16x128xbf16>, vector<2x128xf32> -> vector<2x128xf32>
    %124 = arith.truncf %94 : vector<2x32xf32> to vector<2x32xbf16>
    %cst_38 = arith.constant dense<0.000000e+00> : vector<2x128xf32>
    %125 = tpu.matmul %124, %4, %cst_38 {dimension_numbers = #tpu.dot_dimension_numbers<[1], [0], [0], [1], [0, 0, 1, 1], [], []>} : vector<2x32xbf16>, vector<32x128xbf16>, vector<2x128xf32> -> vector<2x128xf32>
    %126 = arith.addf %123, %125 : vector<2x128xf32>
    %127 = arith.addf %126, %9 : vector<2x128xf32>
    %128 = vector.extract_strided_slice %127 {offsets = [0, 0], sizes = [2, 64], strides = [1, 1]} : vector<2x128xf32> to vector<2x64xf32>
    %129 = arith.negf %128 : vector<2x64xf32>
    %130 = math.exp %129 : vector<2x64xf32>
    %cst_39 = arith.constant 1.000000e+00 : f32
    %131 = vector.broadcast %cst_39 : f32 to vector<2x64xf32>
    %132 = arith.addf %131, %130 : vector<2x64xf32>
    %133 = arith.divf %131, %132 : vector<2x64xf32>
    %134 = vector.extract_strided_slice %133 {offsets = [0, 0], sizes = [2, 32], strides = [1, 1]} : vector<2x64xf32> to vector<2x32xf32>
    %135 = vector.extract_strided_slice %133 {offsets = [0, 32], sizes = [2, 32], strides = [1, 1]} : vector<2x64xf32> to vector<2x32xf32>
    %136 = vector.extract_strided_slice %127 {offsets = [0, 64], sizes = [2, 32], strides = [1, 1]} : vector<2x128xf32> to vector<2x32xf32>
    %137 = vector.extract_strided_slice %127 {offsets = [0, 96], sizes = [2, 32], strides = [1, 1]} : vector<2x128xf32> to vector<2x32xf32>
    %138 = arith.mulf %134, %137 : vector<2x32xf32>
    %139 = arith.addf %136, %138 : vector<2x32xf32>
    %140 = math.tanh %139 : vector<2x32xf32>
    %cst_40 = arith.constant 1.000000e+00 : f32
    %141 = vector.broadcast %cst_40 : f32 to vector<2x32xf32>
    %142 = arith.subf %141, %135 : vector<2x32xf32>
    %143 = arith.mulf %142, %140 : vector<2x32xf32>
    %144 = arith.mulf %135, %94 : vector<2x32xf32>
    %145 = arith.addf %143, %144 : vector<2x32xf32>
    %146 = arith.truncf %145 : vector<2x32xf32> to vector<2x32xbf16>
    %cst_41 = arith.constant dense<0.000000e+00> : vector<2x128xf32>
    %147 = tpu.matmul %146, %5, %cst_41 {dimension_numbers = #tpu.dot_dimension_numbers<[1], [0], [0], [1], [0, 0, 1, 1], [], []>} : vector<2x32xbf16>, vector<32x128xbf16>, vector<2x128xf32> -> vector<2x128xf32>
    %148 = arith.truncf %118 : vector<2x32xf32> to vector<2x32xbf16>
    %cst_42 = arith.constant dense<0.000000e+00> : vector<2x128xf32>
    %149 = tpu.matmul %148, %6, %cst_42 {dimension_numbers = #tpu.dot_dimension_numbers<[1], [0], [0], [1], [0, 0, 1, 1], [], []>} : vector<2x32xbf16>, vector<32x128xbf16>, vector<2x128xf32> -> vector<2x128xf32>
    %150 = arith.addf %147, %149 : vector<2x128xf32>
    %151 = arith.addf %150, %12 : vector<2x128xf32>
    %152 = vector.extract_strided_slice %151 {offsets = [0, 0], sizes = [2, 64], strides = [1, 1]} : vector<2x128xf32> to vector<2x64xf32>
    %153 = arith.negf %152 : vector<2x64xf32>
    %154 = math.exp %153 : vector<2x64xf32>
    %cst_43 = arith.constant 1.000000e+00 : f32
    %155 = vector.broadcast %cst_43 : f32 to vector<2x64xf32>
    %156 = arith.addf %155, %154 : vector<2x64xf32>
    %157 = arith.divf %155, %156 : vector<2x64xf32>
    %158 = vector.extract_strided_slice %157 {offsets = [0, 0], sizes = [2, 32], strides = [1, 1]} : vector<2x64xf32> to vector<2x32xf32>
    %159 = vector.extract_strided_slice %157 {offsets = [0, 32], sizes = [2, 32], strides = [1, 1]} : vector<2x64xf32> to vector<2x32xf32>
    %160 = vector.extract_strided_slice %151 {offsets = [0, 64], sizes = [2, 32], strides = [1, 1]} : vector<2x128xf32> to vector<2x32xf32>
    %161 = vector.extract_strided_slice %151 {offsets = [0, 96], sizes = [2, 32], strides = [1, 1]} : vector<2x128xf32> to vector<2x32xf32>
    %162 = arith.mulf %158, %161 : vector<2x32xf32>
    %163 = arith.addf %160, %162 : vector<2x32xf32>
    %164 = math.tanh %163 : vector<2x32xf32>
    %cst_44 = arith.constant 1.000000e+00 : f32
    %165 = vector.broadcast %cst_44 : f32 to vector<2x32xf32>
    %166 = arith.subf %165, %159 : vector<2x32xf32>
    %167 = arith.mulf %166, %164 : vector<2x32xf32>
    %168 = arith.mulf %159, %118 : vector<2x32xf32>
    %169 = arith.addf %167, %168 : vector<2x32xf32>
    %170 = arith.truncf %169 : vector<2x32xf32> to vector<2x32xbf16>
    %cst_45 = arith.constant dense<0.000000e+00> : vector<2x16xf32>
    %171 = tpu.matmul %170, %13, %cst_45 {dimension_numbers = #tpu.dot_dimension_numbers<[1], [0], [0], [1], [0, 0, 1, 1], [], []>} : vector<2x32xbf16>, vector<32x16xbf16>, vector<2x16xf32> -> vector<2x16xf32>
    %172 = arith.addf %171, %16 : vector<2x16xf32>
    %173 = arith.truncf %172 : vector<2x16xf32> to vector<2x16xbf16>
    %cst_46 = arith.constant dense<0.000000e+00> : vector<2x128xf32>
    %174 = tpu.matmul %173, %3, %cst_46 {dimension_numbers = #tpu.dot_dimension_numbers<[1], [0], [0], [1], [0, 0, 1, 1], [], []>} : vector<2x16xbf16>, vector<16x128xbf16>, vector<2x128xf32> -> vector<2x128xf32>
    %175 = arith.truncf %145 : vector<2x32xf32> to vector<2x32xbf16>
    %cst_47 = arith.constant dense<0.000000e+00> : vector<2x128xf32>
    %176 = tpu.matmul %175, %4, %cst_47 {dimension_numbers = #tpu.dot_dimension_numbers<[1], [0], [0], [1], [0, 0, 1, 1], [], []>} : vector<2x32xbf16>, vector<32x128xbf16>, vector<2x128xf32> -> vector<2x128xf32>
    %177 = arith.addf %174, %176 : vector<2x128xf32>
    %178 = arith.addf %177, %9 : vector<2x128xf32>
    %179 = vector.extract_strided_slice %178 {offsets = [0, 0], sizes = [2, 64], strides = [1, 1]} : vector<2x128xf32> to vector<2x64xf32>
    %180 = arith.negf %179 : vector<2x64xf32>
    %181 = math.exp %180 : vector<2x64xf32>
    %cst_48 = arith.constant 1.000000e+00 : f32
    %182 = vector.broadcast %cst_48 : f32 to vector<2x64xf32>
    %183 = arith.addf %182, %181 : vector<2x64xf32>
    %184 = arith.divf %182, %183 : vector<2x64xf32>
    %185 = vector.extract_strided_slice %184 {offsets = [0, 0], sizes = [2, 32], strides = [1, 1]} : vector<2x64xf32> to vector<2x32xf32>
    %186 = vector.extract_strided_slice %184 {offsets = [0, 32], sizes = [2, 32], strides = [1, 1]} : vector<2x64xf32> to vector<2x32xf32>
    %187 = vector.extract_strided_slice %178 {offsets = [0, 64], sizes = [2, 32], strides = [1, 1]} : vector<2x128xf32> to vector<2x32xf32>
    %188 = vector.extract_strided_slice %178 {offsets = [0, 96], sizes = [2, 32], strides = [1, 1]} : vector<2x128xf32> to vector<2x32xf32>
    %189 = arith.mulf %185, %188 : vector<2x32xf32>
    %190 = arith.addf %187, %189 : vector<2x32xf32>
    %191 = math.tanh %190 : vector<2x32xf32>
    %cst_49 = arith.constant 1.000000e+00 : f32
    %192 = vector.broadcast %cst_49 : f32 to vector<2x32xf32>
    %193 = arith.subf %192, %186 : vector<2x32xf32>
    %194 = arith.mulf %193, %191 : vector<2x32xf32>
    %195 = arith.mulf %186, %145 : vector<2x32xf32>
    %196 = arith.addf %194, %195 : vector<2x32xf32>
    %197 = arith.truncf %196 : vector<2x32xf32> to vector<2x32xbf16>
    %cst_50 = arith.constant dense<0.000000e+00> : vector<2x128xf32>
    %198 = tpu.matmul %197, %5, %cst_50 {dimension_numbers = #tpu.dot_dimension_numbers<[1], [0], [0], [1], [0, 0, 1, 1], [], []>} : vector<2x32xbf16>, vector<32x128xbf16>, vector<2x128xf32> -> vector<2x128xf32>
    %199 = arith.truncf %169 : vector<2x32xf32> to vector<2x32xbf16>
    %cst_51 = arith.constant dense<0.000000e+00> : vector<2x128xf32>
    %200 = tpu.matmul %199, %6, %cst_51 {dimension_numbers = #tpu.dot_dimension_numbers<[1], [0], [0], [1], [0, 0, 1, 1], [], []>} : vector<2x32xbf16>, vector<32x128xbf16>, vector<2x128xf32> -> vector<2x128xf32>
    %201 = arith.addf %198, %200 : vector<2x128xf32>
    %202 = arith.addf %201, %12 : vector<2x128xf32>
    %203 = vector.extract_strided_slice %202 {offsets = [0, 0], sizes = [2, 64], strides = [1, 1]} : vector<2x128xf32> to vector<2x64xf32>
    %204 = arith.negf %203 : vector<2x64xf32>
    %205 = math.exp %204 : vector<2x64xf32>
    %cst_52 = arith.constant 1.000000e+00 : f32
    %206 = vector.broadcast %cst_52 : f32 to vector<2x64xf32>
    %207 = arith.addf %206, %205 : vector<2x64xf32>
    %208 = arith.divf %206, %207 : vector<2x64xf32>
    %209 = vector.extract_strided_slice %208 {offsets = [0, 0], sizes = [2, 32], strides = [1, 1]} : vector<2x64xf32> to vector<2x32xf32>
    %210 = vector.extract_strided_slice %208 {offsets = [0, 32], sizes = [2, 32], strides = [1, 1]} : vector<2x64xf32> to vector<2x32xf32>
    %211 = vector.extract_strided_slice %202 {offsets = [0, 64], sizes = [2, 32], strides = [1, 1]} : vector<2x128xf32> to vector<2x32xf32>
    %212 = vector.extract_strided_slice %202 {offsets = [0, 96], sizes = [2, 32], strides = [1, 1]} : vector<2x128xf32> to vector<2x32xf32>
    %213 = arith.mulf %209, %212 : vector<2x32xf32>
    %214 = arith.addf %211, %213 : vector<2x32xf32>
    %215 = math.tanh %214 : vector<2x32xf32>
    %cst_53 = arith.constant 1.000000e+00 : f32
    %216 = vector.broadcast %cst_53 : f32 to vector<2x32xf32>
    %217 = arith.subf %216, %210 : vector<2x32xf32>
    %218 = arith.mulf %217, %215 : vector<2x32xf32>
    %219 = arith.mulf %210, %169 : vector<2x32xf32>
    %220 = arith.addf %218, %219 : vector<2x32xf32>
    %221 = arith.truncf %220 : vector<2x32xf32> to vector<2x32xbf16>
    %cst_54 = arith.constant dense<0.000000e+00> : vector<2x16xf32>
    %222 = tpu.matmul %221, %13, %cst_54 {dimension_numbers = #tpu.dot_dimension_numbers<[1], [0], [0], [1], [0, 0, 1, 1], [], []>} : vector<2x32xbf16>, vector<32x16xbf16>, vector<2x16xf32> -> vector<2x16xf32>
    %223 = arith.addf %222, %16 : vector<2x16xf32>
    %224 = arith.truncf %223 : vector<2x16xf32> to vector<2x16xbf16>
    %cst_55 = arith.constant dense<0.000000e+00> : vector<2x128xf32>
    %225 = tpu.matmul %224, %3, %cst_55 {dimension_numbers = #tpu.dot_dimension_numbers<[1], [0], [0], [1], [0, 0, 1, 1], [], []>} : vector<2x16xbf16>, vector<16x128xbf16>, vector<2x128xf32> -> vector<2x128xf32>
    %226 = arith.truncf %196 : vector<2x32xf32> to vector<2x32xbf16>
    %cst_56 = arith.constant dense<0.000000e+00> : vector<2x128xf32>
    %227 = tpu.matmul %226, %4, %cst_56 {dimension_numbers = #tpu.dot_dimension_numbers<[1], [0], [0], [1], [0, 0, 1, 1], [], []>} : vector<2x32xbf16>, vector<32x128xbf16>, vector<2x128xf32> -> vector<2x128xf32>
    %228 = arith.addf %225, %227 : vector<2x128xf32>
    %229 = arith.addf %228, %9 : vector<2x128xf32>
    %230 = vector.extract_strided_slice %229 {offsets = [0, 0], sizes = [2, 64], strides = [1, 1]} : vector<2x128xf32> to vector<2x64xf32>
    %231 = arith.negf %230 : vector<2x64xf32>
    %232 = math.exp %231 : vector<2x64xf32>
    %cst_57 = arith.constant 1.000000e+00 : f32
    %233 = vector.broadcast %cst_57 : f32 to vector<2x64xf32>
    %234 = arith.addf %233, %232 : vector<2x64xf32>
    %235 = arith.divf %233, %234 : vector<2x64xf32>
    %236 = vector.extract_strided_slice %235 {offsets = [0, 0], sizes = [2, 32], strides = [1, 1]} : vector<2x64xf32> to vector<2x32xf32>
    %237 = vector.extract_strided_slice %235 {offsets = [0, 32], sizes = [2, 32], strides = [1, 1]} : vector<2x64xf32> to vector<2x32xf32>
    %238 = vector.extract_strided_slice %229 {offsets = [0, 64], sizes = [2, 32], strides = [1, 1]} : vector<2x128xf32> to vector<2x32xf32>
    %239 = vector.extract_strided_slice %229 {offsets = [0, 96], sizes = [2, 32], strides = [1, 1]} : vector<2x128xf32> to vector<2x32xf32>
    %240 = arith.mulf %236, %239 : vector<2x32xf32>
    %241 = arith.addf %238, %240 : vector<2x32xf32>
    %242 = math.tanh %241 : vector<2x32xf32>
    %cst_58 = arith.constant 1.000000e+00 : f32
    %243 = vector.broadcast %cst_58 : f32 to vector<2x32xf32>
    %244 = arith.subf %243, %237 : vector<2x32xf32>
    %245 = arith.mulf %244, %242 : vector<2x32xf32>
    %246 = arith.mulf %237, %196 : vector<2x32xf32>
    %247 = arith.addf %245, %246 : vector<2x32xf32>
    %248 = arith.truncf %247 : vector<2x32xf32> to vector<2x32xbf16>
    %cst_59 = arith.constant dense<0.000000e+00> : vector<2x128xf32>
    %249 = tpu.matmul %248, %5, %cst_59 {dimension_numbers = #tpu.dot_dimension_numbers<[1], [0], [0], [1], [0, 0, 1, 1], [], []>} : vector<2x32xbf16>, vector<32x128xbf16>, vector<2x128xf32> -> vector<2x128xf32>
    %250 = arith.truncf %220 : vector<2x32xf32> to vector<2x32xbf16>
    %cst_60 = arith.constant dense<0.000000e+00> : vector<2x128xf32>
    %251 = tpu.matmul %250, %6, %cst_60 {dimension_numbers = #tpu.dot_dimension_numbers<[1], [0], [0], [1], [0, 0, 1, 1], [], []>} : vector<2x32xbf16>, vector<32x128xbf16>, vector<2x128xf32> -> vector<2x128xf32>
    %252 = arith.addf %249, %251 : vector<2x128xf32>
    %253 = arith.addf %252, %12 : vector<2x128xf32>
    %254 = vector.extract_strided_slice %253 {offsets = [0, 0], sizes = [2, 64], strides = [1, 1]} : vector<2x128xf32> to vector<2x64xf32>
    %255 = arith.negf %254 : vector<2x64xf32>
    %256 = math.exp %255 : vector<2x64xf32>
    %cst_61 = arith.constant 1.000000e+00 : f32
    %257 = vector.broadcast %cst_61 : f32 to vector<2x64xf32>
    %258 = arith.addf %257, %256 : vector<2x64xf32>
    %259 = arith.divf %257, %258 : vector<2x64xf32>
    %260 = vector.extract_strided_slice %259 {offsets = [0, 0], sizes = [2, 32], strides = [1, 1]} : vector<2x64xf32> to vector<2x32xf32>
    %261 = vector.extract_strided_slice %259 {offsets = [0, 32], sizes = [2, 32], strides = [1, 1]} : vector<2x64xf32> to vector<2x32xf32>
    %262 = vector.extract_strided_slice %253 {offsets = [0, 64], sizes = [2, 32], strides = [1, 1]} : vector<2x128xf32> to vector<2x32xf32>
    %263 = vector.extract_strided_slice %253 {offsets = [0, 96], sizes = [2, 32], strides = [1, 1]} : vector<2x128xf32> to vector<2x32xf32>
    %264 = arith.mulf %260, %263 : vector<2x32xf32>
    %265 = arith.addf %262, %264 : vector<2x32xf32>
    %266 = math.tanh %265 : vector<2x32xf32>
    %cst_62 = arith.constant 1.000000e+00 : f32
    %267 = vector.broadcast %cst_62 : f32 to vector<2x32xf32>
    %268 = arith.subf %267, %261 : vector<2x32xf32>
    %269 = arith.mulf %268, %266 : vector<2x32xf32>
    %270 = arith.mulf %261, %220 : vector<2x32xf32>
    %271 = arith.addf %269, %270 : vector<2x32xf32>
    %272 = arith.truncf %271 : vector<2x32xf32> to vector<2x32xbf16>
    %cst_63 = arith.constant dense<0.000000e+00> : vector<2x16xf32>
    %273 = tpu.matmul %272, %13, %cst_63 {dimension_numbers = #tpu.dot_dimension_numbers<[1], [0], [0], [1], [0, 0, 1, 1], [], []>} : vector<2x32xbf16>, vector<32x16xbf16>, vector<2x16xf32> -> vector<2x16xf32>
    %274 = arith.addf %273, %16 : vector<2x16xf32>
    %275 = arith.truncf %274 : vector<2x16xf32> to vector<2x16xbf16>
    %cst_64 = arith.constant dense<0.000000e+00> : vector<2x128xf32>
    %276 = tpu.matmul %275, %3, %cst_64 {dimension_numbers = #tpu.dot_dimension_numbers<[1], [0], [0], [1], [0, 0, 1, 1], [], []>} : vector<2x16xbf16>, vector<16x128xbf16>, vector<2x128xf32> -> vector<2x128xf32>
    %277 = arith.truncf %247 : vector<2x32xf32> to vector<2x32xbf16>
    %cst_65 = arith.constant dense<0.000000e+00> : vector<2x128xf32>
    %278 = tpu.matmul %277, %4, %cst_65 {dimension_numbers = #tpu.dot_dimension_numbers<[1], [0], [0], [1], [0, 0, 1, 1], [], []>} : vector<2x32xbf16>, vector<32x128xbf16>, vector<2x128xf32> -> vector<2x128xf32>
    %279 = arith.addf %276, %278 : vector<2x128xf32>
    %280 = arith.addf %279, %9 : vector<2x128xf32>
    %281 = vector.extract_strided_slice %280 {offsets = [0, 0], sizes = [2, 64], strides = [1, 1]} : vector<2x128xf32> to vector<2x64xf32>
    %282 = arith.negf %281 : vector<2x64xf32>
    %283 = math.exp %282 : vector<2x64xf32>
    %cst_66 = arith.constant 1.000000e+00 : f32
    %284 = vector.broadcast %cst_66 : f32 to vector<2x64xf32>
    %285 = arith.addf %284, %283 : vector<2x64xf32>
    %286 = arith.divf %284, %285 : vector<2x64xf32>
    %287 = vector.extract_strided_slice %286 {offsets = [0, 0], sizes = [2, 32], strides = [1, 1]} : vector<2x64xf32> to vector<2x32xf32>
    %288 = vector.extract_strided_slice %286 {offsets = [0, 32], sizes = [2, 32], strides = [1, 1]} : vector<2x64xf32> to vector<2x32xf32>
    %289 = vector.extract_strided_slice %280 {offsets = [0, 64], sizes = [2, 32], strides = [1, 1]} : vector<2x128xf32> to vector<2x32xf32>
    %290 = vector.extract_strided_slice %280 {offsets = [0, 96], sizes = [2, 32], strides = [1, 1]} : vector<2x128xf32> to vector<2x32xf32>
    %291 = arith.mulf %287, %290 : vector<2x32xf32>
    %292 = arith.addf %289, %291 : vector<2x32xf32>
    %293 = math.tanh %292 : vector<2x32xf32>
    %cst_67 = arith.constant 1.000000e+00 : f32
    %294 = vector.broadcast %cst_67 : f32 to vector<2x32xf32>
    %295 = arith.subf %294, %288 : vector<2x32xf32>
    %296 = arith.mulf %295, %293 : vector<2x32xf32>
    %297 = arith.mulf %288, %247 : vector<2x32xf32>
    %298 = arith.addf %296, %297 : vector<2x32xf32>
    %299 = arith.truncf %298 : vector<2x32xf32> to vector<2x32xbf16>
    %cst_68 = arith.constant dense<0.000000e+00> : vector<2x128xf32>
    %300 = tpu.matmul %299, %5, %cst_68 {dimension_numbers = #tpu.dot_dimension_numbers<[1], [0], [0], [1], [0, 0, 1, 1], [], []>} : vector<2x32xbf16>, vector<32x128xbf16>, vector<2x128xf32> -> vector<2x128xf32>
    %301 = arith.truncf %271 : vector<2x32xf32> to vector<2x32xbf16>
    %cst_69 = arith.constant dense<0.000000e+00> : vector<2x128xf32>
    %302 = tpu.matmul %301, %6, %cst_69 {dimension_numbers = #tpu.dot_dimension_numbers<[1], [0], [0], [1], [0, 0, 1, 1], [], []>} : vector<2x32xbf16>, vector<32x128xbf16>, vector<2x128xf32> -> vector<2x128xf32>
    %303 = arith.addf %300, %302 : vector<2x128xf32>
    %304 = arith.addf %303, %12 : vector<2x128xf32>
    %305 = vector.extract_strided_slice %304 {offsets = [0, 0], sizes = [2, 64], strides = [1, 1]} : vector<2x128xf32> to vector<2x64xf32>
    %306 = arith.negf %305 : vector<2x64xf32>
    %307 = math.exp %306 : vector<2x64xf32>
    %cst_70 = arith.constant 1.000000e+00 : f32
    %308 = vector.broadcast %cst_70 : f32 to vector<2x64xf32>
    %309 = arith.addf %308, %307 : vector<2x64xf32>
    %310 = arith.divf %308, %309 : vector<2x64xf32>
    %311 = vector.extract_strided_slice %310 {offsets = [0, 0], sizes = [2, 32], strides = [1, 1]} : vector<2x64xf32> to vector<2x32xf32>
    %312 = vector.extract_strided_slice %310 {offsets = [0, 32], sizes = [2, 32], strides = [1, 1]} : vector<2x64xf32> to vector<2x32xf32>
    %313 = vector.extract_strided_slice %304 {offsets = [0, 64], sizes = [2, 32], strides = [1, 1]} : vector<2x128xf32> to vector<2x32xf32>
    %314 = vector.extract_strided_slice %304 {offsets = [0, 96], sizes = [2, 32], strides = [1, 1]} : vector<2x128xf32> to vector<2x32xf32>
    %315 = arith.mulf %311, %314 : vector<2x32xf32>
    %316 = arith.addf %313, %315 : vector<2x32xf32>
    %317 = math.tanh %316 : vector<2x32xf32>
    %cst_71 = arith.constant 1.000000e+00 : f32
    %318 = vector.broadcast %cst_71 : f32 to vector<2x32xf32>
    %319 = arith.subf %318, %312 : vector<2x32xf32>
    %320 = arith.mulf %319, %317 : vector<2x32xf32>
    %321 = arith.mulf %312, %271 : vector<2x32xf32>
    %322 = arith.addf %320, %321 : vector<2x32xf32>
    %323 = arith.truncf %322 : vector<2x32xf32> to vector<2x32xbf16>
    %cst_72 = arith.constant dense<0.000000e+00> : vector<2x16xf32>
    %324 = tpu.matmul %323, %13, %cst_72 {dimension_numbers = #tpu.dot_dimension_numbers<[1], [0], [0], [1], [0, 0, 1, 1], [], []>} : vector<2x32xbf16>, vector<32x16xbf16>, vector<2x16xf32> -> vector<2x16xf32>
    %325 = arith.addf %324, %16 : vector<2x16xf32>
    %326 = arith.truncf %325 : vector<2x16xf32> to vector<2x16xbf16>
    %cst_73 = arith.constant dense<0.000000e+00> : vector<2x128xf32>
    %327 = tpu.matmul %326, %3, %cst_73 {dimension_numbers = #tpu.dot_dimension_numbers<[1], [0], [0], [1], [0, 0, 1, 1], [], []>} : vector<2x16xbf16>, vector<16x128xbf16>, vector<2x128xf32> -> vector<2x128xf32>
    %328 = arith.truncf %298 : vector<2x32xf32> to vector<2x32xbf16>
    %cst_74 = arith.constant dense<0.000000e+00> : vector<2x128xf32>
    %329 = tpu.matmul %328, %4, %cst_74 {dimension_numbers = #tpu.dot_dimension_numbers<[1], [0], [0], [1], [0, 0, 1, 1], [], []>} : vector<2x32xbf16>, vector<32x128xbf16>, vector<2x128xf32> -> vector<2x128xf32>
    %330 = arith.addf %327, %329 : vector<2x128xf32>
    %331 = arith.addf %330, %9 : vector<2x128xf32>
    %332 = vector.extract_strided_slice %331 {offsets = [0, 0], sizes = [2, 64], strides = [1, 1]} : vector<2x128xf32> to vector<2x64xf32>
    %333 = arith.negf %332 : vector<2x64xf32>
    %334 = math.exp %333 : vector<2x64xf32>
    %cst_75 = arith.constant 1.000000e+00 : f32
    %335 = vector.broadcast %cst_75 : f32 to vector<2x64xf32>
    %336 = arith.addf %335, %334 : vector<2x64xf32>
    %337 = arith.divf %335, %336 : vector<2x64xf32>
    %338 = vector.extract_strided_slice %337 {offsets = [0, 0], sizes = [2, 32], strides = [1, 1]} : vector<2x64xf32> to vector<2x32xf32>
    %339 = vector.extract_strided_slice %337 {offsets = [0, 32], sizes = [2, 32], strides = [1, 1]} : vector<2x64xf32> to vector<2x32xf32>
    %340 = vector.extract_strided_slice %331 {offsets = [0, 64], sizes = [2, 32], strides = [1, 1]} : vector<2x128xf32> to vector<2x32xf32>
    %341 = vector.extract_strided_slice %331 {offsets = [0, 96], sizes = [2, 32], strides = [1, 1]} : vector<2x128xf32> to vector<2x32xf32>
    %342 = arith.mulf %338, %341 : vector<2x32xf32>
    %343 = arith.addf %340, %342 : vector<2x32xf32>
    %344 = math.tanh %343 : vector<2x32xf32>
    %cst_76 = arith.constant 1.000000e+00 : f32
    %345 = vector.broadcast %cst_76 : f32 to vector<2x32xf32>
    %346 = arith.subf %345, %339 : vector<2x32xf32>
    %347 = arith.mulf %346, %344 : vector<2x32xf32>
    %348 = arith.mulf %339, %298 : vector<2x32xf32>
    %349 = arith.addf %347, %348 : vector<2x32xf32>
    %350 = arith.truncf %349 : vector<2x32xf32> to vector<2x32xbf16>
    %cst_77 = arith.constant dense<0.000000e+00> : vector<2x128xf32>
    %351 = tpu.matmul %350, %5, %cst_77 {dimension_numbers = #tpu.dot_dimension_numbers<[1], [0], [0], [1], [0, 0, 1, 1], [], []>} : vector<2x32xbf16>, vector<32x128xbf16>, vector<2x128xf32> -> vector<2x128xf32>
    %352 = arith.truncf %322 : vector<2x32xf32> to vector<2x32xbf16>
    %cst_78 = arith.constant dense<0.000000e+00> : vector<2x128xf32>
    %353 = tpu.matmul %352, %6, %cst_78 {dimension_numbers = #tpu.dot_dimension_numbers<[1], [0], [0], [1], [0, 0, 1, 1], [], []>} : vector<2x32xbf16>, vector<32x128xbf16>, vector<2x128xf32> -> vector<2x128xf32>
    %354 = arith.addf %351, %353 : vector<2x128xf32>
    %355 = arith.addf %354, %12 : vector<2x128xf32>
    %356 = vector.extract_strided_slice %355 {offsets = [0, 0], sizes = [2, 64], strides = [1, 1]} : vector<2x128xf32> to vector<2x64xf32>
    %357 = arith.negf %356 : vector<2x64xf32>
    %358 = math.exp %357 : vector<2x64xf32>
    %cst_79 = arith.constant 1.000000e+00 : f32
    %359 = vector.broadcast %cst_79 : f32 to vector<2x64xf32>
    %360 = arith.addf %359, %358 : vector<2x64xf32>
    %361 = arith.divf %359, %360 : vector<2x64xf32>
    %362 = vector.extract_strided_slice %361 {offsets = [0, 0], sizes = [2, 32], strides = [1, 1]} : vector<2x64xf32> to vector<2x32xf32>
    %363 = vector.extract_strided_slice %361 {offsets = [0, 32], sizes = [2, 32], strides = [1, 1]} : vector<2x64xf32> to vector<2x32xf32>
    %364 = vector.extract_strided_slice %355 {offsets = [0, 64], sizes = [2, 32], strides = [1, 1]} : vector<2x128xf32> to vector<2x32xf32>
    %365 = vector.extract_strided_slice %355 {offsets = [0, 96], sizes = [2, 32], strides = [1, 1]} : vector<2x128xf32> to vector<2x32xf32>
    %366 = arith.mulf %362, %365 : vector<2x32xf32>
    %367 = arith.addf %364, %366 : vector<2x32xf32>
    %368 = math.tanh %367 : vector<2x32xf32>
    %cst_80 = arith.constant 1.000000e+00 : f32
    %369 = vector.broadcast %cst_80 : f32 to vector<2x32xf32>
    %370 = arith.subf %369, %363 : vector<2x32xf32>
    %371 = arith.mulf %370, %368 : vector<2x32xf32>
    %372 = arith.mulf %363, %322 : vector<2x32xf32>
    %373 = arith.addf %371, %372 : vector<2x32xf32>
    %374 = arith.truncf %373 : vector<2x32xf32> to vector<2x32xbf16>
    %cst_81 = arith.constant dense<0.000000e+00> : vector<2x16xf32>
    %375 = tpu.matmul %374, %13, %cst_81 {dimension_numbers = #tpu.dot_dimension_numbers<[1], [0], [0], [1], [0, 0, 1, 1], [], []>} : vector<2x32xbf16>, vector<32x16xbf16>, vector<2x16xf32> -> vector<2x16xf32>
    %376 = arith.addf %375, %16 : vector<2x16xf32>
    %377 = arith.truncf %376 : vector<2x16xf32> to vector<2x16xbf16>
    %cst_82 = arith.constant dense<0.000000e+00> : vector<2x128xf32>
    %378 = tpu.matmul %377, %3, %cst_82 {dimension_numbers = #tpu.dot_dimension_numbers<[1], [0], [0], [1], [0, 0, 1, 1], [], []>} : vector<2x16xbf16>, vector<16x128xbf16>, vector<2x128xf32> -> vector<2x128xf32>
    %379 = arith.truncf %349 : vector<2x32xf32> to vector<2x32xbf16>
    %cst_83 = arith.constant dense<0.000000e+00> : vector<2x128xf32>
    %380 = tpu.matmul %379, %4, %cst_83 {dimension_numbers = #tpu.dot_dimension_numbers<[1], [0], [0], [1], [0, 0, 1, 1], [], []>} : vector<2x32xbf16>, vector<32x128xbf16>, vector<2x128xf32> -> vector<2x128xf32>
    %381 = arith.addf %378, %380 : vector<2x128xf32>
    %382 = arith.addf %381, %9 : vector<2x128xf32>
    %383 = vector.extract_strided_slice %382 {offsets = [0, 0], sizes = [2, 64], strides = [1, 1]} : vector<2x128xf32> to vector<2x64xf32>
    %384 = arith.negf %383 : vector<2x64xf32>
    %385 = math.exp %384 : vector<2x64xf32>
    %cst_84 = arith.constant 1.000000e+00 : f32
    %386 = vector.broadcast %cst_84 : f32 to vector<2x64xf32>
    %387 = arith.addf %386, %385 : vector<2x64xf32>
    %388 = arith.divf %386, %387 : vector<2x64xf32>
    %389 = vector.extract_strided_slice %388 {offsets = [0, 0], sizes = [2, 32], strides = [1, 1]} : vector<2x64xf32> to vector<2x32xf32>
    %390 = vector.extract_strided_slice %388 {offsets = [0, 32], sizes = [2, 32], strides = [1, 1]} : vector<2x64xf32> to vector<2x32xf32>
    %391 = vector.extract_strided_slice %382 {offsets = [0, 64], sizes = [2, 32], strides = [1, 1]} : vector<2x128xf32> to vector<2x32xf32>
    %392 = vector.extract_strided_slice %382 {offsets = [0, 96], sizes = [2, 32], strides = [1, 1]} : vector<2x128xf32> to vector<2x32xf32>
    %393 = arith.mulf %389, %392 : vector<2x32xf32>
    %394 = arith.addf %391, %393 : vector<2x32xf32>
    %395 = math.tanh %394 : vector<2x32xf32>
    %cst_85 = arith.constant 1.000000e+00 : f32
    %396 = vector.broadcast %cst_85 : f32 to vector<2x32xf32>
    %397 = arith.subf %396, %390 : vector<2x32xf32>
    %398 = arith.mulf %397, %395 : vector<2x32xf32>
    %399 = arith.mulf %390, %349 : vector<2x32xf32>
    %400 = arith.addf %398, %399 : vector<2x32xf32>
    %401 = arith.truncf %400 : vector<2x32xf32> to vector<2x32xbf16>
    %cst_86 = arith.constant dense<0.000000e+00> : vector<2x128xf32>
    %402 = tpu.matmul %401, %5, %cst_86 {dimension_numbers = #tpu.dot_dimension_numbers<[1], [0], [0], [1], [0, 0, 1, 1], [], []>} : vector<2x32xbf16>, vector<32x128xbf16>, vector<2x128xf32> -> vector<2x128xf32>
    %403 = arith.truncf %373 : vector<2x32xf32> to vector<2x32xbf16>
    %cst_87 = arith.constant dense<0.000000e+00> : vector<2x128xf32>
    %404 = tpu.matmul %403, %6, %cst_87 {dimension_numbers = #tpu.dot_dimension_numbers<[1], [0], [0], [1], [0, 0, 1, 1], [], []>} : vector<2x32xbf16>, vector<32x128xbf16>, vector<2x128xf32> -> vector<2x128xf32>
    %405 = arith.addf %402, %404 : vector<2x128xf32>
    %406 = arith.addf %405, %12 : vector<2x128xf32>
    %407 = vector.extract_strided_slice %406 {offsets = [0, 0], sizes = [2, 64], strides = [1, 1]} : vector<2x128xf32> to vector<2x64xf32>
    %408 = arith.negf %407 : vector<2x64xf32>
    %409 = math.exp %408 : vector<2x64xf32>
    %cst_88 = arith.constant 1.000000e+00 : f32
    %410 = vector.broadcast %cst_88 : f32 to vector<2x64xf32>
    %411 = arith.addf %410, %409 : vector<2x64xf32>
    %412 = arith.divf %410, %411 : vector<2x64xf32>
    %413 = vector.extract_strided_slice %412 {offsets = [0, 0], sizes = [2, 32], strides = [1, 1]} : vector<2x64xf32> to vector<2x32xf32>
    %414 = vector.extract_strided_slice %412 {offsets = [0, 32], sizes = [2, 32], strides = [1, 1]} : vector<2x64xf32> to vector<2x32xf32>
    %415 = vector.extract_strided_slice %406 {offsets = [0, 64], sizes = [2, 32], strides = [1, 1]} : vector<2x128xf32> to vector<2x32xf32>
    %416 = vector.extract_strided_slice %406 {offsets = [0, 96], sizes = [2, 32], strides = [1, 1]} : vector<2x128xf32> to vector<2x32xf32>
    %417 = arith.mulf %413, %416 : vector<2x32xf32>
    %418 = arith.addf %415, %417 : vector<2x32xf32>
    %419 = math.tanh %418 : vector<2x32xf32>
    %cst_89 = arith.constant 1.000000e+00 : f32
    %420 = vector.broadcast %cst_89 : f32 to vector<2x32xf32>
    %421 = arith.subf %420, %414 : vector<2x32xf32>
    %422 = arith.mulf %421, %419 : vector<2x32xf32>
    %423 = arith.mulf %414, %373 : vector<2x32xf32>
    %424 = arith.addf %422, %423 : vector<2x32xf32>
    %425 = arith.truncf %424 : vector<2x32xf32> to vector<2x32xbf16>
    %cst_90 = arith.constant dense<0.000000e+00> : vector<2x16xf32>
    %426 = tpu.matmul %425, %13, %cst_90 {dimension_numbers = #tpu.dot_dimension_numbers<[1], [0], [0], [1], [0, 0, 1, 1], [], []>} : vector<2x32xbf16>, vector<32x16xbf16>, vector<2x16xf32> -> vector<2x16xf32>
    %427 = arith.addf %426, %16 : vector<2x16xf32>
    %428 = tpu.concatenate %70, %121, %172, %223, %274, %325, %376, %427 in 1 : vector<2x16xf32>, vector<2x16xf32>, vector<2x16xf32>, vector<2x16xf32>, vector<2x16xf32>, vector<2x16xf32>, vector<2x16xf32>, vector<2x16xf32> -> vector<2x128xf32>
    %429 = arith.index_cast %c0_i32_19 : i32 to index
    %c0_91 = arith.constant 0 : index
    %c0_92 = arith.constant 0 : index
    %430 = vector.load %arg7[%429, %c0_91, %c0_92] : memref<1x2x128xf32, #tpu.memory_space<vmem>>, vector<1x2x128xf32>
    %431 = vector.shape_cast %430 : vector<1x2x128xf32> to vector<2x128xf32>
    %432 = vector.shape_cast %428 : vector<2x128xf32> to vector<1x2x128xf32>
    tpu.vector_store %arg7[%429, %c0_91, %c0_92], %432 {strides = array<i32>} : memref<1x2x128xf32, #tpu.memory_space<vmem>>, vector<1x2x128xf32>,
    %c1_i32 = arith.constant 1 : i32
    %c0_93 = arith.constant 0 : index
    %c0_94 = arith.constant 0 : index
    %433 = vector.load %arg10[%c0_93, %c0_94] : memref<2x16xf32, #tpu.memory_space<vmem>>, vector<2x16xf32>
    tpu.vector_store %arg10[%c0_93, %c0_94], %427 {strides = array<i32>} : memref<2x16xf32, #tpu.memory_space<vmem>>, vector<2x16xf32>,
    %c0_95 = arith.constant 0 : index
    %c0_96 = arith.constant 0 : index
    %434 = vector.load %arg8[%c0_95, %c0_96] : memref<2x32xf32, #tpu.memory_space<vmem>>, vector<2x32xf32>
    tpu.vector_store %arg8[%c0_95, %c0_96], %400 {strides = array<i32>} : memref<2x32xf32, #tpu.memory_space<vmem>>, vector<2x32xf32>,
    %c0_97 = arith.constant 0 : index
    %c0_98 = arith.constant 0 : index
    %435 = vector.load %arg9[%c0_97, %c0_98] : memref<2x32xf32, #tpu.memory_space<vmem>>, vector<2x32xf32>
    tpu.vector_store %arg9[%c0_97, %c0_98], %424 {strides = array<i32>} : memref<2x32xf32, #tpu.memory_space<vmem>>, vector<2x32xf32>,
    return
  }
  func.func @transform_0(%arg0: i32) -> (i32, i32) {
    %c0_i32 = arith.constant 0 : i32
    %c0_i32_0 = arith.constant 0 : i32
    %c0_i32_1 = arith.constant 0 : i32
    return %c0_i32, %c0_i32_0 : i32, i32
  }
  func.func @transform_1(%arg0: i32) -> (i32, i32) {
    %c0_i32 = arith.constant 0 : i32
    %c0_i32_0 = arith.constant 0 : i32
    %c0_i32_1 = arith.constant 0 : i32
    return %c0_i32, %c0_i32_0 : i32, i32
  }
  func.func @transform_2(%arg0: i32) -> (i32, i32) {
    %c0_i32 = arith.constant 0 : i32
    %c0_i32_0 = arith.constant 0 : i32
    %c0_i32_1 = arith.constant 0 : i32
    return %c0_i32, %c0_i32_0 : i32, i32
  }
  func.func @transform_3(%arg0: i32) -> (i32, i32) {
    %c0_i32 = arith.constant 0 : i32
    %c0_i32_0 = arith.constant 0 : i32
    %c0_i32_1 = arith.constant 0 : i32
    return %c0_i32, %c0_i32_0 : i32, i32
  }
  func.func @transform_4(%arg0: i32) -> (i32, i32) {
    %c0_i32 = arith.constant 0 : i32
    %c0_i32_0 = arith.constant 0 : i32
    %c0_i32_1 = arith.constant 0 : i32
    return %c0_i32, %c0_i32_0 : i32, i32
  }
  func.func @transform_5(%arg0: i32) -> (i32, i32) {
    %c0_i32 = arith.constant 0 : i32
    %c0_i32_0 = arith.constant 0 : i32
    %c0_i32_1 = arith.constant 0 : i32
    return %c0_i32, %c0_i32_0 : i32, i32
  }
  func.func @transform_6(%arg0: i32) -> (i32, i32, i32) {
    %c0_i32 = arith.constant 0 : i32
    %c0_i32_0 = arith.constant 0 : i32
    %c0_i32_1 = arith.constant 0 : i32
    return %arg0, %c0_i32, %c0_i32_0 : i32, i32, i32
  }
}

</mosaic_0001>

<bundles_post_ra>
// kernel: pde_rnn_forward.1
= control target key start
LH: loop header
LB: loop body
LE: loop exit
PB: predicated region body
PF: predicated region fallthrough
CT: control target
= control target key end

     0   :  { %11 = vsyncpa [#allocation6], 0  ;;  %s2237_s0 = inlined_call_operand.hbm [shape: f32[2,16], index: 0, kind: input, shape index: {}]   ;;  %s2238_s1 = inlined_call_operand.vmem [shape: bf16[48,128], index: 1, kind: input, shape index: {}]   ;;  %s2239_s2 = inlined_call_operand.hbm [shape: bf16[64,128], index: 2, kind: input, shape index: {}]   ;;  %s2240_s3 = inlined_call_operand.vmem [shape: f32[2,128], index: 3, kind: input, shape index: {}]   ;;  %s2241_s4 = inlined_call_operand.vmem [shape: bf16[32,16], index: 4, kind: input, shape index: {}]   ;;  %s2242_s5 = inlined_call_operand.vmem [shape: f32[1,16], index: 5, kind: input, shape index: {}]   ;;  %s2243_s6 = inlined_call_operand.vmem [shape: f32[1,2,128], index: 6, kind: output, shape index: {}]  }
   0x1   :  { %s18_s23 = sshll.u32 %s2237_s0, 4  ;;  %s19_s23 = int_to_ptr.hbm [resolvable:$true] %s18_s23 }
   0x2   :  { %12 = vsyncpa [#allocation8], 0  ;;  %s1788_s24 = smov [#allocation5]   ;;  %s30_s28 = sshll.u32 %s2239_s2, 4  ;;  %s31_s28 = int_to_ptr.hbm [resolvable:$true] %s30_s28 }
   0x3   :  { %s20_s25 = sshll.u32 %s1788_s24, 4  ;;  %s1789_s29 = smov [#allocation7]   ;;  %s21_s25 = int_to_ptr.vmem [resolvable:$true] %s20_s25 }
   0x4   :  { %23 = dma.hbm_to_vmem [thread:$0]  %s19_s23, 32, %s21_s25, [#allocation6]  }
   0x5   :  { %s32_s30 = sshll.u32 %s1789_s29, 4  ;;  %s1790_s7 = smov 64   ;;  %s33_s30 = int_to_ptr.vmem [resolvable:$true] %s32_s30 }
   0x6   :  { %s1791_s8 = smov 4  }
   0x7   :  { %38 = dma.hbm_to_vmem [thread:$0]  %s31_s28, 512, %s33_s30, [#allocation8], %s1790_s7, %s1790_s7, %s1791_s8  }
   0x8   :  { %1784 = dma.done.wait [#allocation6], 32  }
   0x9   :  { %1785 = vsyncadd [#allocation6], 4294967264 }
   0xa   :  { %1786 = dma.done.wait [#allocation8], 512  }
   0xb   :  { %1787 = vsyncadd [#allocation8], 4294966784  ;;  %vm58_vm0 = vcmask 254976   ;;  %v1792_v0 = vmov 0.0   ;;  %vm62_vm1 = vcmask 123904   ;;  %v1847_v1 = vld [vmem:[%s2238_s1 + $0x10] sm:$0xff] }
   0xc   :  { %59 = vst.msk [vmem:[#allocation2] sm:$0x3] %vm58_vm0, %v1792_v0  ;;  %v1852_v2 = vld [vmem:[%s2238_s1 + $0x8] sm:$0xff]  ;;  %v1857_v3 = vld [vmem:[%s2238_s1] sm:$0xff]  ;;  %117 = vmatpush.bf16.msra.mxu0 %v1847_v1  ;;  %vm107_vm2 = vcmask 261120   ;;  %vm130_vm3 = vcmask 130048  }
   0xd   :  { %60 = vst.msk [vmem:[#allocation3] sm:$0x3] %vm58_vm0, %v1792_v0  ;;  %v61_v5 = vld [vmem:[#allocation5] sm:$0x3]  ;;  %141 = vmatpush.bf16.msra.mxu1 %v1857_v3  ;;  %v1870_v10 = vld [vmem:[%s2240_s3] ss:$0 sm:$0xff] }
   0xe   :  { %63 = vst.msk [vmem:[#allocation4] sm:$0x3] %vm62_vm1, %v61_v5  ;;  %s1793_s15 = smov 32   ;;  %s1794_s16 = smov 96   ;;  %v1877_v34 = vld [vmem:[#allocation7 + $0x18] sm:$0xff]  ;;  %v1879_v35 = vld [vmem:[#allocation7 + $0x8] sm:$0xff] }
   0xf   :  { %213 = vmatpush.bf16.msra.mxu2 %v1877_v34  ;;  %v1882_v36 = vld [vmem:[#allocation7 + $0x10] sm:$0xff]  ;;  %244 = vmatpush.bf16.msra.mxu3 %v1879_v35  ;;  %v1885_v38 = vld [vmem:[#allocation7] sm:$0xff]  ;;  %v1908_v51 = vld [vmem:[%s2240_s3 + $0x1] ss:$0 sm:$0xff]  ;;  %s1796_s13 = smov 80   ;;  %s1798_s14 = smov 112  }
  0x10   :  { %118 = vmatpush.bf16.msra.mxu0 %v1852_v2 }
  0x13   :  { %v91_v4 = vld [vmem:[#allocation2] sm:$0x3]  ;;  %214 = vmatpush.bf16.msra.mxu2 %v1882_v36  ;;  %245 = vmatpush.bf16.msra.mxu3 %v1885_v38 }
  0x14   :  { %v94_v6 = vpack.c.bf16 %v91_v4, %v91_v4  ;;  %333 = vmatpush.bf16.msrb.mxu0 %v1847_v1  ;;  %v92_v37 = vld [vmem:[#allocation3] sm:$0x3] }
  0x15   :  { %v90_v7 = vld [vmem:[#allocation4] sm:$0x3]  ;;  %v191_v39 = vpack.c.bf16 %v92_v37, %v92_v37 }
  0x16   :  { %1521 = vmatmul.msk.bf16.vlgmr.msra.gmra.mxu0 %vm107_vm2, %v94_v6  ;;  %v93_v8 = vpack.c.bf16 %v90_v7, %v90_v7 }
  0x17   :  { %350 = vmatpush.bf16.msrb.mxu2 %v1857_v3  ;;  %402 = vmatpush.bf16.msrb.mxu3 %v1877_v34 }
  0x18   :  { %334 = vmatpush.bf16.msrb.mxu0 %v1852_v2  ;;  %1526 = vmatmul.msk.bf16.vlgmr.msra.gmra.mxu1 %vm130_vm3, %v93_v8 }
  0x19   :  { %1536 = vmatmul.msk.bf16.vlgmr.msra.gmra.mxu2 %vm107_vm2, %v191_v39 }
  0x1b   :  { %494 = vmatpush.bf16.msra.mxu2 %v1847_v1  ;;  %403 = vmatpush.bf16.msrb.mxu3 %v1882_v36 }
  0x1f   :  { %495 = vmatpush.bf16.msra.mxu2 %v1852_v2 }
  0x93   :  { %v120_v9 = vpop.f32.mrf.mxu0 }
  0x95   :  { %v143_v11 = vpop.f32.mrf.mxu1 }
  0x96   :  { %v144_v12 = vadd.f32 %v143_v11, %v120_v9 }
  0x98   :  { %v147_v13 = vadd.f32 %v1870_v10, %v144_v12 }
  0x9a   :  { %168 = vrot.lane.b32.xlu0 %v147_v13, %s1793_s15  ;;  %v1527_v16 = vmul.f32 -1.442695, %v147_v13 }
  0x9b   :  { %v122_v14 = vpop.f32.mrf.mxu0 }
  0x9c   :  { %1628 = vpow2.f32 %v1527_v16  ;;  %v216_v48 = vpop.f32.mrf.mxu2  ;;  %v1924_v16 = vld [vmem:[%s2241_s4] sm:$0xff] }
  0x9d   :  { %v145_v15 = vpop.f32.mrf.mxu1 }
  0x9e   :  { %v1918_v15 = vld [vmem:[%s2241_s4 + $0x8] sm:$0xff] }
  0x9f   :  { %319 = vmatpush.bf16.msrb.mxu1 %v1918_v15  ;;  %480 = vmatpush.bf16.msra.mxu0 %v1918_v15 }
  0xa2   :  { %v1629_v17 = vpop.eup %1628 }
  0xa3   :  { %v151_v18 = vadd.f32 1.0, %v1629_v17  ;;  %320 = vmatpush.bf16.msrb.mxu1 %v1924_v16  ;;  %481 = vmatpush.bf16.msra.mxu0 %v1924_v16 }
  0xa4   :  { %v218_v49 = vpop.f32.mrf.mxu2 }
  0xa5   :  { %1630 = vrcp.f32 %v151_v18  ;;  %v163_v24 = vand.u32 2147483648, %v151_v18  ;;  %vm157_vm5 = vweird.f32 %v151_v18  ;;  %v161_v25 = vand.u32 2147483647, %v151_v18 }
  0xa7   :  { %v164_v27 = vor.u32 1.1754944e-38, %v163_v24  ;;  %vm162_vm7 = vcmp.eq.f32.partialorder %v161_v25, 8.507059e+37  ;;  %421 = vmatpush.bf16.msra.mxu1 %v1879_v35  ;;  %v1947_v25 = vld [vmem:[%s2242_s5] ss:$0 sm:$0xff] }
  0xab   :  { %v1631_v19 = vpop.eup %1630  ;;  %422 = vmatpush.bf16.msra.mxu1 %v1885_v38 }
  0xac   :  { %v153_v20 = vmul.f32 %v1631_v19, %v151_v18  ;;  %vm158_vm4 = vweird.f32 %v1631_v19 }
  0xad   :  { %vm159_vm6 = vmor %vm157_vm5, %vm158_vm4 }
  0xae   :  { %v154_v21 = vsub.f32 1.0, %v153_v20 }
  0xb0   :  { %v155_v22 = vmul.f32 %v1631_v19, %v154_v21 }
  0xb2   :  { %v156_v23 = vadd.f32 %v1631_v19, %v155_v22 }
  0xb4   :  { %v160_v26 = vsel %vm159_vm6, %v1631_v19, %v156_v23 }
  0xb5   :  { %v165_v29 = vsel %vm162_vm7, %v164_v27, %v160_v26 }
  0xb6   :  { %v178_v41 = vsub.f32 1.0, %v165_v29 }
 0x10c   :  { %v169_v28 = vpop.permute.xlu0 %168 }
 0x10d   :  { %v171_v30 = vmul.f32 %v169_v28, %v165_v29 }
 0x10f   :  { %173 = vrot.lane.b32.xlu0 %v171_v30, %s1790_s7 }
 0x181   :  { %v174_v31 = vpop.permute.xlu0 %173 }
 0x182   :  { %v176_v32 = vadd.f32 %v174_v31, %v147_v13 }
 0x184   :  { %1632 = vtanh.f32 %v176_v32 }
 0x18a   :  { %v1633_v33 = vpop.eup %1632 }
 0x18b   :  { %180 = vrot.lane.b32.xlu1 %v1633_v33, %s1794_s16 }
 0x193   :  { %185 = vrot.lane.b32.xlu1 %v91_v4, %s1793_s15 }
 0x1fd   :  { %v181_v40 = vpop.permute.xlu1 %180 }
 0x1fe   :  { %v183_v43 = vmul.f32 %v181_v40, %v178_v41 }
 0x205   :  { %v186_v42 = vpop.permute.xlu1 %185 }
 0x206   :  { %v188_v44 = vmul.f32 %v186_v42, %v165_v29 }
 0x208   :  { %v1895_v45 = vadd.f32 %v188_v44, %v183_v43 }
 0x20a   :  { %v190_v46 = vpack.c.bf16 %v1895_v45, %v1895_v45 }
 0x20c   :  { %221 = vrot.lane.b32.xlu2 %v190_v46, %s1794_s16 }
 0x266   :  { %v222_v47 = vpop.permute.xlu2 %221 }
 0x267   :  { %1545 = vmatmul.msk.bf16.vlgmr.msra.gmra.mxu3 %vm107_vm2, %v222_v47  ;;  %1556 = vmatmul.msk.bf16.vlgmr.msrb.gmra.mxu0 %vm107_vm2, %v222_v47 }
 0x268   :  { %511 = vmatpush.bf16.msra.mxu3 %v1857_v3  ;;  %582 = vmatpush.bf16.msrb.mxu0 %v1879_v35 }
 0x26c   :  { %583 = vmatpush.bf16.msrb.mxu0 %v1885_v38 }
 0x2e4   :  { %v1903_v50 = vpop.f32.mrf.mxu0 }
 0x2ea   :  { %v247_v52 = vpop.f32.mrf.mxu3 }
 0x2eb   :  { %v248_v53 = vadd.f32 %v247_v52, %v216_v48 }
 0x2ec   :  { %v338_v54 = vpop.f32.mrf.mxu0 }
 0x2ed   :  { %v251_v55 = vadd.f32 %v1908_v51, %v248_v53 }
 0x2ef   :  { %272 = vrot.lane.b32.xlu2 %v251_v55, %s1793_s15  ;;  %v1546_v57 = vmul.f32 -1.442695, %v251_v55 }
 0x2f1   :  { %1634 = vpow2.f32 %v1546_v57 }
 0x2f2   :  { %v249_v56 = vpop.f32.mrf.mxu3 }
 0x2f7   :  { %289 = vrot.lane.b32.xlu2 %v92_v37, %s1793_s15  ;;  %v1635_v58 = vpop.eup %1634 }
 0x2f8   :  { %v255_v59 = vadd.f32 1.0, %v1635_v58 }
 0x2fa   :  { %1636 = vrcp.f32 %v255_v59  ;;  %v267_v4 = vand.u32 2147483648, %v255_v59  ;;  %vm261_vm9 = vweird.f32 %v255_v59  ;;  %v265_v5 = vand.u32 2147483647, %v255_v59 }
 0x2fc   :  { %v268_v7 = vor.u32 1.1754944e-38, %v267_v4  ;;  %vm266_vm11 = vcmp.eq.f32.partialorder %v265_v5, 8.507059e+37 }
 0x300   :  { %v1637_v60 = vpop.eup %1636 }
 0x301   :  { %v257_v61 = vmul.f32 %v1637_v60, %v255_v59  ;;  %vm262_vm8 = vweird.f32 %v1637_v60 }
 0x302   :  { %vm263_vm10 = vmor %vm261_vm9, %vm262_vm8 }
 0x303   :  { %v258_v62 = vsub.f32 1.0, %v257_v61 }
 0x305   :  { %v259_v63 = vmul.f32 %v1637_v60, %v258_v62 }
 0x307   :  { %v260_v0 = vadd.f32 %v1637_v60, %v259_v63 }
 0x309   :  { %v264_v6 = vsel %vm263_vm10, %v1637_v60, %v260_v0 }
 0x30a   :  { %v269_v9 = vsel %vm266_vm11, %v268_v7, %v264_v6 }
 0x30b   :  { %v282_v18 = vsub.f32 1.0, %v269_v9 }
 0x349   :  { %v273_v8 = vpop.permute.xlu2 %272 }
 0x34a   :  { %v275_v11 = vmul.f32 %v273_v8, %v269_v9 }
 0x34c   :  { %277 = vrot.lane.b32.xlu0 %v275_v11, %s1790_s7 }
 0x351   :  { %v290_v17 = vpop.permute.xlu2 %289 }
 0x352   :  { %v292_v20 = vmul.f32 %v290_v17, %v269_v9 }
 0x3be   :  { %v278_v12 = vpop.permute.xlu0 %277 }
 0x3bf   :  { %v280_v13 = vadd.f32 %v278_v12, %v251_v55 }
 0x3c1   :  { %1638 = vtanh.f32 %v280_v13 }
 0x3c7   :  { %v1639_v14 = vpop.eup %1638 }
 0x3c8   :  { %284 = vrot.lane.b32.xlu1 %v1639_v14, %s1794_s16 }
 0x43a   :  { %v285_v19 = vpop.permute.xlu1 %284 }
 0x43b   :  { %v287_v21 = vmul.f32 %v285_v19, %v282_v18 }
 0x43d   :  { %v1933_v22 = vadd.f32 %v292_v20, %v287_v21 }
 0x43f   :  { %v294_v23 = vpack.c.bf16 %v1933_v22, %v1933_v22 }
 0x441   :  { %296 = vrot.lane.b32.xlu0 %v294_v23, %s1794_s16 }
 0x4b3   :  { %v297_v24 = vpop.permute.xlu0 %296 }
 0x4b4   :  { %1555 = vmatmul.msk.bf16.vlgmr.msrb.gmra.mxu1 %vm107_vm2, %v297_v24  ;;  %1559 = vmatmul.msk.bf16.vlgmr.msrb.gmra.mxu3 %vm107_vm2, %v297_v24 }
 0x4b5   :  { %563 = vmatpush.bf16.msrb.mxu1 %v1877_v34  ;;  %655 = vmatpush.bf16.msrb.mxu3 %v1847_v1 }
 0x4b9   :  { %564 = vmatpush.bf16.msrb.mxu1 %v1882_v36  ;;  %656 = vmatpush.bf16.msrb.mxu3 %v1852_v2 }
 0x531   :  { %v322_v26 = vpop.f32.mrf.mxu1 }
 0x532   :  { %v1950_v27 = vadd.f32 %v1947_v25, %v322_v26 }
 0x534   :  { %v326_v28 = vpack.c.bf16 %v1950_v27, %v1950_v27 }
 0x536   :  { %1557 = vmatmul.msk.bf16.vlgmr.msrb.gmra.mxu2 %vm130_vm3, %v326_v28 }
 0x537   :  { %v405_v29 = vpop.f32.mrf.mxu3  ;;  %641 = vmatpush.bf16.msrb.mxu2 %v1918_v15 }
 0x539   :  { %v324_v30 = vpop.f32.mrf.mxu1 }
 0x53b   :  { %642 = vmatpush.bf16.msrb.mxu2 %v1924_v16 }
 0x53f   :  { %v407_v31 = vpop.f32.mrf.mxu3 }
 0x5b9   :  { %v352_v32 = vpop.f32.mrf.mxu2 }
 0x5ba   :  { %v353_v33 = vadd.f32 %v352_v32, %v1903_v50 }
 0x5bc   :  { %v356_v37 = vadd.f32 %v1870_v10, %v353_v33 }
 0x5be   :  { %377 = vrot.lane.b32.xlu1 %v356_v37, %s1793_s15  ;;  %v1558_v40 = vmul.f32 -1.442695, %v356_v37 }
 0x5c0   :  { %1640 = vpow2.f32 %v1558_v40 }
 0x5c1   :  { %v354_v39 = vpop.f32.mrf.mxu2 }
 0x5c6   :  { %v1641_v41 = vpop.eup %1640 }
 0x5c7   :  { %v360_v42 = vadd.f32 1.0, %v1641_v41 }
 0x5c9   :  { %1642 = vrcp.f32 %v360_v42  ;;  %v372_v49 = vand.u32 2147483648, %v360_v42  ;;  %vm366_vm13 = vweird.f32 %v360_v42  ;;  %v370_v52 = vand.u32 2147483647, %v360_v42 }
 0x5cb   :  { %v373_v53 = vor.u32 1.1754944e-38, %v372_v49  ;;  %vm371_vm15 = vcmp.eq.f32.partialorder %v370_v52, 8.507059e+37 }
 0x5cf   :  { %v1643_v43 = vpop.eup %1642 }
 0x5d0   :  { %v362_v44 = vmul.f32 %v1643_v43, %v360_v42  ;;  %vm367_vm12 = vweird.f32 %v1643_v43 }
 0x5d1   :  { %vm368_vm14 = vmor %vm366_vm13, %vm367_vm12 }
 0x5d2   :  { %v363_v46 = vsub.f32 1.0, %v362_v44 }
 0x5d4   :  { %v364_v47 = vmul.f32 %v1643_v43, %v363_v46 }
 0x5d6   :  { %v365_v48 = vadd.f32 %v1643_v43, %v364_v47 }
 0x5d8   :  { %v369_v50 = vsel %vm368_vm14, %v1643_v43, %v365_v48 }
 0x5d9   :  { %v374_v55 = vsel %vm371_vm15, %v373_v53, %v369_v50 }
 0x5da   :  { %v387_v60 = vsub.f32 1.0, %v374_v55  ;;  %v393_v62 = vmul.f32 %v374_v55, %v1895_v45 }
 0x630   :  { %v378_v54 = vpop.permute.xlu1 %377 }
 0x631   :  { %v380_v56 = vmul.f32 %v378_v54, %v374_v55 }
 0x633   :  { %382 = vrot.lane.b32.xlu2 %v380_v56, %s1790_s7 }
 0x68d   :  { %v383_v57 = vpop.permute.xlu2 %382 }
 0x68e   :  { %v385_v58 = vadd.f32 %v383_v57, %v356_v37 }
 0x690   :  { %1644 = vtanh.f32 %v385_v58 }
 0x696   :  { %v1645_v59 = vpop.eup %1644 }
 0x697   :  { %389 = vrot.lane.b32.xlu0 %v1645_v59, %s1794_s16 }
 0x709   :  { %v390_v61 = vpop.permute.xlu0 %389 }
 0x70a   :  { %v392_v63 = vmul.f32 %v390_v61, %v387_v60 }
 0x70c   :  { %v1963_v0 = vadd.f32 %v393_v62, %v392_v63 }
 0x70e   :  { %v395_v4 = vpack.c.bf16 %v1963_v0, %v1963_v0 }
 0x710   :  { %410 = vrot.lane.b32.xlu1 %v395_v4, %s1794_s16 }
 0x782   :  { %v411_v5 = vpop.permute.xlu1 %410 }
 0x783   :  { %1560 = vmatmul.msk.bf16.vlgmr.msra.gmra.mxu1 %vm107_vm2, %v411_v5  ;;  %1563 = vmatmul.msk.bf16.vlgmr.msra.gmra.mxu2 %vm107_vm2, %v411_v5 }
 0x784   :  { %672 = vmatpush.bf16.msra.mxu1 %v1857_v3  ;;  %743 = vmatpush.bf16.msra.mxu2 %v1879_v35 }
 0x788   :  { %744 = vmatpush.bf16.msra.mxu2 %v1885_v38 }
 0x800   :  { %v424_v45 = vpop.f32.mrf.mxu1 }
 0x801   :  { %v425_v6 = vadd.f32 %v424_v45, %v405_v29 }
 0x803   :  { %v428_v7 = vadd.f32 %v1908_v51, %v425_v6 }
 0x805   :  { %449 = vrot.lane.b32.xlu2 %v428_v7, %s1793_s15  ;;  %v1561_v12 = vmul.f32 -1.442695, %v428_v7 }
 0x806   :  { %v497_v8 = vpop.f32.mrf.mxu2 }
 0x807   :  { %1646 = vpow2.f32 %v1561_v12 }
 0x808   :  { %v426_v9 = vpop.f32.mrf.mxu1 }
 0x80d   :  { %v1647_v13 = vpop.eup %1646 }
 0x80e   :  { %v499_v11 = vpop.f32.mrf.mxu2  ;;  %v432_v14 = vadd.f32 1.0, %v1647_v13 }
 0x810   :  { %1648 = vrcp.f32 %v432_v14  ;;  %v444_v23 = vand.u32 2147483648, %v432_v14  ;;  %vm438_vm5 = vweird.f32 %v432_v14  ;;  %v442_v24 = vand.u32 2147483647, %v432_v14 }
 0x812   :  { %v445_v28 = vor.u32 1.1754944e-38, %v444_v23  ;;  %vm443_vm7 = vcmp.eq.f32.partialorder %v442_v24, 8.507059e+37 }
 0x816   :  { %v1649_v17 = vpop.eup %1648 }
 0x817   :  { %v434_v18 = vmul.f32 %v1649_v17, %v432_v14  ;;  %vm439_vm4 = vweird.f32 %v1649_v17 }
 0x818   :  { %vm440_vm6 = vmor %vm438_vm5, %vm439_vm4 }
 0x819   :  { %v435_v19 = vsub.f32 1.0, %v434_v18 }
 0x81b   :  { %v436_v20 = vmul.f32 %v1649_v17, %v435_v19 }
 0x81d   :  { %v437_v21 = vadd.f32 %v1649_v17, %v436_v20 }
 0x81f   :  { %v441_v26 = vsel %vm440_vm6, %v1649_v17, %v437_v21 }
 0x820   :  { %v446_v30 = vsel %vm443_vm7, %v445_v28, %v441_v26 }
 0x821   :  { %v459_v39 = vsub.f32 1.0, %v446_v30  ;;  %v465_v41 = vmul.f32 %v446_v30, %v1933_v22 }
 0x85f   :  { %v450_v29 = vpop.permute.xlu2 %449 }
 0x860   :  { %v452_v31 = vmul.f32 %v450_v29, %v446_v30 }
 0x862   :  { %454 = vrot.lane.b32.xlu0 %v452_v31, %s1790_s7 }
 0x8d4   :  { %v455_v32 = vpop.permute.xlu0 %454 }
 0x8d5   :  { %v457_v33 = vadd.f32 %v455_v32, %v428_v7 }
 0x8d7   :  { %1650 = vtanh.f32 %v457_v33 }
 0x8dd   :  { %v1651_v37 = vpop.eup %1650 }
 0x8de   :  { %461 = vrot.lane.b32.xlu1 %v1651_v37, %s1794_s16 }
 0x950   :  { %v462_v40 = vpop.permute.xlu1 %461 }
 0x951   :  { %v464_v42 = vmul.f32 %v462_v40, %v459_v39 }
 0x953   :  { %v1978_v43 = vadd.f32 %v465_v41, %v464_v42 }
 0x955   :  { %v467_v44 = vpack.c.bf16 %v1978_v43, %v1978_v43 }
 0x957   :  { %469 = vrot.lane.b32.xlu2 %v467_v44, %s1794_s16 }
 0x9b1   :  { %v470_v46 = vpop.permute.xlu2 %469 }
 0x9b2   :  { %1562 = vmatmul.msk.bf16.vlgmr.msra.gmra.mxu0 %vm107_vm2, %v470_v46  ;;  %1566 = vmatmul.msk.bf16.vlgmr.msrb.gmra.mxu1 %vm107_vm2, %v470_v46 }
 0x9b3   :  { %724 = vmatpush.bf16.msra.mxu0 %v1877_v34  ;;  %816 = vmatpush.bf16.msrb.mxu1 %v1847_v1 }
 0x9b7   :  { %725 = vmatpush.bf16.msra.mxu0 %v1882_v36  ;;  %817 = vmatpush.bf16.msrb.mxu1 %v1852_v2 }
 0xa2f   :  { %v483_v22 = vpop.f32.mrf.mxu0  ;;  %v566_v47 = vpop.f32.mrf.mxu1 }
 0xa30   :  { %v1990_v48 = vadd.f32 %v1947_v25, %v483_v22 }
 0xa32   :  { %v487_v49 = vpack.c.bf16 %v1990_v48, %v1990_v48 }
 0xa34   :  { %1564 = vmatmul.msk.bf16.vlgmr.msra.gmra.mxu3 %vm130_vm3, %v487_v49 }
 0xa35   :  { %802 = vmatpush.bf16.msra.mxu3 %v1918_v15 }
 0xa37   :  { %v485_v52 = vpop.f32.mrf.mxu0  ;;  %v568_v50 = vpop.f32.mrf.mxu1 }
 0xa39   :  { %803 = vmatpush.bf16.msra.mxu3 %v1924_v16 }
 0xab7   :  { %v513_v53 = vpop.f32.mrf.mxu3 }
 0xab8   :  { %v514_v54 = vadd.f32 %v513_v53, %v497_v8 }
 0xaba   :  { %v517_v55 = vadd.f32 %v1870_v10, %v514_v54 }
 0xabc   :  { %538 = vrot.lane.b32.xlu0 %v517_v55, %s1793_s15  ;;  %v1565_v57 = vmul.f32 -1.442695, %v517_v55 }
 0xabe   :  { %1652 = vpow2.f32 %v1565_v57 }
 0xabf   :  { %v515_v56 = vpop.f32.mrf.mxu3 }
 0xac4   :  { %v1653_v58 = vpop.eup %1652 }
 0xac5   :  { %v521_v59 = vadd.f32 1.0, %v1653_v58 }
 0xac7   :  { %1654 = vrcp.f32 %v521_v59  ;;  %v533_v5 = vand.u32 2147483648, %v521_v59  ;;  %vm527_vm9 = vweird.f32 %v521_v59  ;;  %v531_v45 = vand.u32 2147483647, %v521_v59 }
 0xac9   :  { %v534_v7 = vor.u32 1.1754944e-38, %v533_v5  ;;  %vm532_vm11 = vcmp.eq.f32.partialorder %v531_v45, 8.507059e+37 }
 0xacd   :  { %v1655_v60 = vpop.eup %1654 }
 0xace   :  { %v523_v61 = vmul.f32 %v1655_v60, %v521_v59  ;;  %vm528_vm8 = vweird.f32 %v1655_v60 }
 0xacf   :  { %vm529_vm10 = vmor %vm527_vm9, %vm528_vm8 }
 0xad0   :  { %v524_v62 = vsub.f32 1.0, %v523_v61 }
 0xad2   :  { %v525_v63 = vmul.f32 %v1655_v60, %v524_v62 }
 0xad4   :  { %v526_v4 = vadd.f32 %v1655_v60, %v525_v63 }
 0xad6   :  { %v530_v6 = vsel %vm529_vm10, %v1655_v60, %v526_v4 }
 0xad7   :  { %v535_v9 = vsel %vm532_vm11, %v534_v7, %v530_v6 }
 0xad8   :  { %v548_v17 = vsub.f32 1.0, %v535_v9  ;;  %v554_v19 = vmul.f32 %v535_v9, %v1963_v0 }
 0xb2e   :  { %v539_v8 = vpop.permute.xlu0 %538 }
 0xb2f   :  { %v541_v11 = vmul.f32 %v539_v8, %v535_v9 }
 0xb31   :  { %543 = vrot.lane.b32.xlu1 %v541_v11, %s1790_s7 }
 0xba3   :  { %v544_v12 = vpop.permute.xlu1 %543 }
 0xba4   :  { %v546_v13 = vadd.f32 %v544_v12, %v517_v55 }
 0xba6   :  { %1656 = vtanh.f32 %v546_v13 }
 0xbac   :  { %v1657_v14 = vpop.eup %1656 }
 0xbad   :  { %550 = vrot.lane.b32.xlu2 %v1657_v14, %s1794_s16 }
 0xc07   :  { %v551_v18 = vpop.permute.xlu2 %550 }
 0xc08   :  { %v553_v20 = vmul.f32 %v551_v18, %v548_v17 }
 0xc0a   :  { %v2002_v21 = vadd.f32 %v554_v19, %v553_v20 }
 0xc0c   :  { %v556_v23 = vpack.c.bf16 %v2002_v21, %v2002_v21 }
 0xc0e   :  { %571 = vrot.lane.b32.xlu0 %v556_v23, %s1794_s16 }
 0xc80   :  { %v572_v24 = vpop.permute.xlu0 %571 }
 0xc81   :  { %1567 = vmatmul.msk.bf16.vlgmr.msrb.gmra.mxu0 %vm107_vm2, %v572_v24  ;;  %1570 = vmatmul.msk.bf16.vlgmr.msrb.gmra.mxu3 %vm107_vm2, %v572_v24 }
 0xc82   :  { %833 = vmatpush.bf16.msrb.mxu0 %v1857_v3  ;;  %904 = vmatpush.bf16.msrb.mxu3 %v1879_v35 }
 0xc86   :  { %905 = vmatpush.bf16.msrb.mxu3 %v1885_v38 }
 0xcfe   :  { %v585_v0 = vpop.f32.mrf.mxu0 }
 0xcff   :  { %v586_v26 = vadd.f32 %v585_v0, %v566_v47 }
 0xd01   :  { %v589_v28 = vadd.f32 %v1908_v51, %v586_v26 }
 0xd03   :  { %610 = vrot.lane.b32.xlu1 %v589_v28, %s1793_s15  ;;  %v1568_v32 = vmul.f32 -1.442695, %v589_v28 }
 0xd04   :  { %v658_v29 = vpop.f32.mrf.mxu3 }
 0xd05   :  { %1658 = vpow2.f32 %v1568_v32 }
 0xd06   :  { %v587_v30 = vpop.f32.mrf.mxu0 }
 0xd0b   :  { %v1659_v33 = vpop.eup %1658 }
 0xd0c   :  { %v660_v31 = vpop.f32.mrf.mxu3  ;;  %v593_v37 = vadd.f32 1.0, %v1659_v33 }
 0xd0e   :  { %1660 = vrcp.f32 %v593_v37  ;;  %v605_v46 = vand.u32 2147483648, %v593_v37  ;;  %vm599_vm13 = vweird.f32 %v593_v37  ;;  %v603_v22 = vand.u32 2147483647, %v593_v37 }
 0xd10   :  { %v606_v49 = vor.u32 1.1754944e-38, %v605_v46  ;;  %vm604_vm15 = vcmp.eq.f32.partialorder %v603_v22, 8.507059e+37 }
 0xd14   :  { %v1661_v39 = vpop.eup %1660 }
 0xd15   :  { %v595_v40 = vmul.f32 %v1661_v39, %v593_v37  ;;  %vm600_vm12 = vweird.f32 %v1661_v39 }
 0xd16   :  { %vm601_vm14 = vmor %vm599_vm13, %vm600_vm12 }
 0xd17   :  { %v596_v41 = vsub.f32 1.0, %v595_v40 }
 0xd19   :  { %v597_v42 = vmul.f32 %v1661_v39, %v596_v41 }
 0xd1b   :  { %v598_v44 = vadd.f32 %v1661_v39, %v597_v42 }
 0xd1d   :  { %v602_v47 = vsel %vm601_vm14, %v1661_v39, %v598_v44 }
 0xd1e   :  { %v607_v50 = vsel %vm604_vm15, %v606_v49, %v602_v47 }
 0xd1f   :  { %v620_v57 = vsub.f32 1.0, %v607_v50  ;;  %v626_v59 = vmul.f32 %v607_v50, %v1978_v43 }
 0xd75   :  { %v611_v52 = vpop.permute.xlu1 %610 }
 0xd76   :  { %v613_v53 = vmul.f32 %v611_v52, %v607_v50 }
 0xd78   :  { %615 = vrot.lane.b32.xlu2 %v613_v53, %s1790_s7 }
 0xdd2   :  { %v616_v54 = vpop.permute.xlu2 %615 }
 0xdd3   :  { %v618_v55 = vadd.f32 %v616_v54, %v589_v28 }
 0xdd5   :  { %1662 = vtanh.f32 %v618_v55 }
 0xddb   :  { %v1663_v56 = vpop.eup %1662 }
 0xddc   :  { %622 = vrot.lane.b32.xlu0 %v1663_v56, %s1794_s16 }
 0xe4e   :  { %v623_v58 = vpop.permute.xlu0 %622 }
 0xe4f   :  { %v625_v60 = vmul.f32 %v623_v58, %v620_v57 }
 0xe51   :  { %v2017_v61 = vadd.f32 %v626_v59, %v625_v60 }
 0xe53   :  { %v628_v62 = vpack.c.bf16 %v2017_v61, %v2017_v61 }
 0xe55   :  { %630 = vrot.lane.b32.xlu1 %v628_v62, %s1794_s16 }
 0xec7   :  { %v631_v63 = vpop.permute.xlu1 %630 }
 0xec8   :  { %1569 = vmatmul.msk.bf16.vlgmr.msrb.gmra.mxu2 %vm107_vm2, %v631_v63  ;;  %1573 = vmatmul.msk.bf16.vlgmr.msra.gmra.mxu0 %vm107_vm2, %v631_v63 }
 0xec9   :  { %885 = vmatpush.bf16.msrb.mxu2 %v1877_v34  ;;  %977 = vmatpush.bf16.msra.mxu0 %v1847_v1 }
 0xecd   :  { %886 = vmatpush.bf16.msrb.mxu2 %v1882_v36  ;;  %978 = vmatpush.bf16.msra.mxu0 %v1852_v2 }
 0xf45   :  { %v727_v43 = vpop.f32.mrf.mxu0 }
 0xf4b   :  { %v644_v4 = vpop.f32.mrf.mxu2 }
 0xf4c   :  { %v2029_v5 = vadd.f32 %v1947_v25, %v644_v4 }
 0xf4d   :  { %v729_v45 = vpop.f32.mrf.mxu0 }
 0xf4e   :  { %v648_v6 = vpack.c.bf16 %v2029_v5, %v2029_v5 }
 0xf50   :  { %1571 = vmatmul.msk.bf16.vlgmr.msra.gmra.mxu1 %vm130_vm3, %v648_v6 }
 0xf51   :  { %963 = vmatpush.bf16.msra.mxu1 %v1918_v15 }
 0xf53   :  { %v646_v7 = vpop.f32.mrf.mxu2 }
 0xf55   :  { %964 = vmatpush.bf16.msra.mxu1 %v1924_v16 }
 0xfcd   :  { %v674_v8 = vpop.f32.mrf.mxu1 }
 0xfce   :  { %v675_v9 = vadd.f32 %v674_v8, %v658_v29 }
 0xfd0   :  { %v678_v11 = vadd.f32 %v1870_v10, %v675_v9 }
 0xfd2   :  { %699 = vrot.lane.b32.xlu2 %v678_v11, %s1793_s15  ;;  %v1572_v13 = vmul.f32 -1.442695, %v678_v11 }
 0xfd4   :  { %1664 = vpow2.f32 %v1572_v13 }
 0xfd5   :  { %v676_v12 = vpop.f32.mrf.mxu1 }
 0xfda   :  { %v1665_v14 = vpop.eup %1664 }
 0xfdb   :  { %v682_v17 = vadd.f32 1.0, %v1665_v14 }
 0xfdd   :  { %1666 = vrcp.f32 %v682_v17  ;;  %v694_v0 = vand.u32 2147483648, %v682_v17  ;;  %vm688_vm5 = vweird.f32 %v682_v17  ;;  %v692_v26 = vand.u32 2147483647, %v682_v17 }
 0xfdf   :  { %v695_v29 = vor.u32 1.1754944e-38, %v694_v0  ;;  %vm693_vm7 = vcmp.eq.f32.partialorder %v692_v26, 8.507059e+37 }
 0xfe3   :  { %v1667_v18 = vpop.eup %1666 }
 0xfe4   :  { %v684_v19 = vmul.f32 %v1667_v18, %v682_v17  ;;  %vm689_vm4 = vweird.f32 %v1667_v18 }
 0xfe5   :  { %vm690_vm6 = vmor %vm688_vm5, %vm689_vm4 }
 0xfe6   :  { %v685_v20 = vsub.f32 1.0, %v684_v19 }
 0xfe8   :  { %v686_v23 = vmul.f32 %v1667_v18, %v685_v20 }
 0xfea   :  { %v687_v24 = vadd.f32 %v1667_v18, %v686_v23 }
 0xfec   :  { %v691_v28 = vsel %vm690_vm6, %v1667_v18, %v687_v24 }
 0xfed   :  { %v696_v31 = vsel %vm693_vm7, %v695_v29, %v691_v28 }
 0xfee   :  { %v709_v40 = vsub.f32 1.0, %v696_v31  ;;  %v715_v42 = vmul.f32 %v696_v31, %v2002_v21 }
0x102c   :  { %v700_v30 = vpop.permute.xlu2 %699 }
0x102d   :  { %v702_v32 = vmul.f32 %v700_v30, %v696_v31 }
0x102f   :  { %704 = vrot.lane.b32.xlu0 %v702_v32, %s1790_s7 }
0x10a1   :  { %v705_v33 = vpop.permute.xlu0 %704 }
0x10a2   :  { %v707_v37 = vadd.f32 %v705_v33, %v678_v11 }
0x10a4   :  { %1668 = vtanh.f32 %v707_v37 }
0x10aa   :  { %v1669_v39 = vpop.eup %1668 }
0x10ab   :  { %711 = vrot.lane.b32.xlu1 %v1669_v39, %s1794_s16 }
0x111d   :  { %v712_v41 = vpop.permute.xlu1 %711 }
0x111e   :  { %v714_v44 = vmul.f32 %v712_v41, %v709_v40 }
0x1120   :  { %v2041_v46 = vadd.f32 %v715_v42, %v714_v44 }
0x1122   :  { %v717_v22 = vpack.c.bf16 %v2041_v46, %v2041_v46 }
0x1124   :  { %732 = vrot.lane.b32.xlu2 %v717_v22, %s1794_s16 }
0x117e   :  { %v733_v47 = vpop.permute.xlu2 %732 }
0x117f   :  { %1574 = vmatmul.msk.bf16.vlgmr.msra.gmra.mxu2 %vm107_vm2, %v733_v47  ;;  %1577 = vmatmul.msk.bf16.vlgmr.msrb.gmra.mxu1 %vm107_vm2, %v733_v47 }
0x1180   :  { %994 = vmatpush.bf16.msra.mxu2 %v1857_v3  ;;  %1065 = vmatpush.bf16.msrb.mxu1 %v1879_v35 }
0x1184   :  { %1066 = vmatpush.bf16.msrb.mxu1 %v1885_v38 }
0x11fc   :  { %v819_v21 = vpop.f32.mrf.mxu1 }
0x1202   :  { %v746_v49 = vpop.f32.mrf.mxu2 }
0x1203   :  { %v747_v52 = vadd.f32 %v746_v49, %v727_v43 }
0x1204   :  { %v821_v50 = vpop.f32.mrf.mxu1 }
0x1205   :  { %v750_v53 = vadd.f32 %v1908_v51, %v747_v52 }
0x1207   :  { %771 = vrot.lane.b32.xlu0 %v750_v53, %s1793_s15  ;;  %v1575_v55 = vmul.f32 -1.442695, %v750_v53 }
0x1209   :  { %1670 = vpow2.f32 %v1575_v55 }
0x120a   :  { %v748_v54 = vpop.f32.mrf.mxu2 }
0x120f   :  { %v1671_v56 = vpop.eup %1670 }
0x1210   :  { %v754_v57 = vadd.f32 1.0, %v1671_v56 }
0x1212   :  { %1672 = vrcp.f32 %v754_v57  ;;  %v766_v4 = vand.u32 2147483648, %v754_v57  ;;  %vm760_vm9 = vweird.f32 %v754_v57  ;;  %v764_v43 = vand.u32 2147483647, %v754_v57 }
0x1214   :  { %v767_v6 = vor.u32 1.1754944e-38, %v766_v4  ;;  %vm765_vm11 = vcmp.eq.f32.partialorder %v764_v43, 8.507059e+37 }
0x1218   :  { %v1673_v58 = vpop.eup %1672 }
0x1219   :  { %v756_v59 = vmul.f32 %v1673_v58, %v754_v57  ;;  %vm761_vm8 = vweird.f32 %v1673_v58 }
0x121a   :  { %vm762_vm10 = vmor %vm760_vm9, %vm761_vm8 }
0x121b   :  { %v757_v60 = vsub.f32 1.0, %v756_v59 }
0x121d   :  { %v758_v62 = vmul.f32 %v1673_v58, %v757_v60 }
0x121f   :  { %v759_v63 = vadd.f32 %v1673_v58, %v758_v62 }
0x1221   :  { %v763_v45 = vsel %vm762_vm10, %v1673_v58, %v759_v63 }
0x1222   :  { %v768_v8 = vsel %vm765_vm11, %v767_v6, %v763_v45 }
0x1223   :  { %v781_v14 = vsub.f32 1.0, %v768_v8  ;;  %v787_v18 = vmul.f32 %v768_v8, %v2017_v61 }
0x1279   :  { %v772_v7 = vpop.permute.xlu0 %771 }
0x127a   :  { %v774_v9 = vmul.f32 %v772_v7, %v768_v8 }
0x127c   :  { %776 = vrot.lane.b32.xlu1 %v774_v9, %s1790_s7 }
0x12ee   :  { %v777_v11 = vpop.permute.xlu1 %776 }
0x12ef   :  { %v779_v12 = vadd.f32 %v777_v11, %v750_v53 }
0x12f1   :  { %1674 = vtanh.f32 %v779_v12 }
0x12f7   :  { %v1675_v13 = vpop.eup %1674 }
0x12f8   :  { %783 = vrot.lane.b32.xlu2 %v1675_v13, %s1794_s16 }
0x1352   :  { %v784_v17 = vpop.permute.xlu2 %783 }
0x1353   :  { %v786_v19 = vmul.f32 %v784_v17, %v781_v14 }
0x1355   :  { %v2056_v20 = vadd.f32 %v787_v18, %v786_v19 }
0x1357   :  { %v789_v23 = vpack.c.bf16 %v2056_v20, %v2056_v20 }
0x1359   :  { %791 = vrot.lane.b32.xlu0 %v789_v23, %s1794_s16 }
0x13cb   :  { %v792_v24 = vpop.permute.xlu0 %791 }
0x13cc   :  { %1576 = vmatmul.msk.bf16.vlgmr.msra.gmra.mxu3 %vm107_vm2, %v792_v24  ;;  %1580 = vmatmul.msk.bf16.vlgmr.msrb.gmra.mxu2 %vm107_vm2, %v792_v24 }
0x13cd   :  { %1046 = vmatpush.bf16.msra.mxu3 %v1877_v34  ;;  %1138 = vmatpush.bf16.msrb.mxu2 %v1847_v1 }
0x13d1   :  { %1047 = vmatpush.bf16.msra.mxu3 %v1882_v36  ;;  %1139 = vmatpush.bf16.msrb.mxu2 %v1852_v2 }
0x144f   :  { %v805_v61 = vpop.f32.mrf.mxu3  ;;  %v888_v0 = vpop.f32.mrf.mxu2 }
0x1450   :  { %v2068_v26 = vadd.f32 %v1947_v25, %v805_v61 }
0x1452   :  { %v809_v28 = vpack.c.bf16 %v2068_v26, %v2068_v26 }
0x1454   :  { %1578 = vmatmul.msk.bf16.vlgmr.msrb.gmra.mxu0 %vm130_vm3, %v809_v28 }
0x1455   :  { %1124 = vmatpush.bf16.msrb.mxu0 %v1918_v15 }
0x1457   :  { %v807_v29 = vpop.f32.mrf.mxu3  ;;  %v890_v30 = vpop.f32.mrf.mxu2 }
0x1459   :  { %1125 = vmatpush.bf16.msrb.mxu0 %v1924_v16 }
0x14d1   :  { %v835_v1 = vpop.f32.mrf.mxu0 }
0x14d2   :  { %v836_v31 = vadd.f32 %v835_v1, %v819_v21 }
0x14d4   :  { %v839_v2 = vadd.f32 %v1870_v10, %v836_v31 }
0x14d6   :  { %860 = vrot.lane.b32.xlu1 %v839_v2, %s1793_s15  ;;  %v1579_v33 = vmul.f32 -1.442695, %v839_v2 }
0x14d8   :  { %1676 = vpow2.f32 %v1579_v33 }
0x14d9   :  { %v837_v32 = vpop.f32.mrf.mxu0 }
0x14de   :  { %v1677_v37 = vpop.eup %1676 }
0x14df   :  { %v843_v39 = vadd.f32 1.0, %v1677_v37 }
0x14e1   :  { %1678 = vrcp.f32 %v843_v39  ;;  %v855_v47 = vand.u32 2147483648, %v843_v39  ;;  %vm849_vm13 = vweird.f32 %v843_v39  ;;  %v853_v49 = vand.u32 2147483647, %v843_v39 }
0x14e3   :  { %v856_v10 = vor.u32 1.1754944e-38, %v855_v47  ;;  %vm854_vm15 = vcmp.eq.f32.partialorder %v853_v49, 8.507059e+37  ;;  %v2121_v49 = vld [vmem:[%s2240_s3] ss:$0 sm:$0xff] }
0x14e7   :  { %v1679_v40 = vpop.eup %1678 }
0x14e8   :  { %v845_v41 = vmul.f32 %v1679_v40, %v843_v39  ;;  %vm850_vm12 = vweird.f32 %v1679_v40  ;;  %v1724_v39 = vld [vmem:[%s2238_s1 + $0x10] sm:$0xff] }
0x14e9   :  { %vm851_vm14 = vmor %vm849_vm13, %vm850_vm12 }
0x14ea   :  { %v846_v42 = vsub.f32 1.0, %v845_v41 }
0x14ec   :  { %v847_v44 = vmul.f32 %v1679_v40, %v846_v42 }
0x14ee   :  { %v848_v22 = vadd.f32 %v1679_v40, %v847_v44 }
0x14f0   :  { %v852_v21 = vsel %vm851_vm14, %v1679_v40, %v848_v22 }
0x14f1   :  { %v857_v50 = vsel %vm854_vm15, %v856_v10, %v852_v21 }
0x14f2   :  { %v870_v57 = vsub.f32 1.0, %v857_v50  ;;  %v876_v59 = vmul.f32 %v857_v50, %v2041_v46 }
0x1548   :  { %v861_v52 = vpop.permute.xlu1 %860 }
0x1549   :  { %v863_v53 = vmul.f32 %v861_v52, %v857_v50 }
0x154b   :  { %865 = vrot.lane.b32.xlu2 %v863_v53, %s1790_s7 }
0x15a5   :  { %v866_v54 = vpop.permute.xlu2 %865 }
0x15a6   :  { %v868_v55 = vadd.f32 %v866_v54, %v839_v2 }
0x15a8   :  { %1680 = vtanh.f32 %v868_v55 }
0x15ae   :  { %v1681_v56 = vpop.eup %1680 }
0x15af   :  { %872 = vrot.lane.b32.xlu0 %v1681_v56, %s1794_s16 }
0x1621   :  { %v873_v58 = vpop.permute.xlu0 %872 }
0x1622   :  { %v875_v60 = vmul.f32 %v873_v58, %v870_v57 }
0x1624   :  { %v2080_v62 = vadd.f32 %v876_v59, %v875_v60 }
0x1626   :  { %v878_v63 = vpack.c.bf16 %v2080_v62, %v2080_v62 }
0x1628   :  { %893 = vrot.lane.b32.xlu1 %v878_v63, %s1794_s16 }
0x169a   :  { %v894_v4 = vpop.permute.xlu1 %893 }
0x169b   :  { %1581 = vmatmul.msk.bf16.vlgmr.msrb.gmra.mxu3 %vm107_vm2, %v894_v4  ;;  %1584 = vmatmul.msk.bf16.vlgmr.msra.gmra.mxu0 %vm107_vm2, %v894_v4 }
0x169c   :  { %1155 = vmatpush.bf16.msrb.mxu3 %v1857_v3  ;;  %1226 = vmatpush.bf16.msra.mxu0 %v1879_v35 }
0x16a0   :  { %1227 = vmatpush.bf16.msra.mxu0 %v1885_v38 }
0x1718   :  { %v980_v46 = vpop.f32.mrf.mxu0 }
0x171e   :  { %v907_v43 = vpop.f32.mrf.mxu3 }
0x171f   :  { %v908_v45 = vadd.f32 %v907_v43, %v888_v0 }
0x1720   :  { %v982_v6 = vpop.f32.mrf.mxu0 }
0x1721   :  { %v911_v7 = vadd.f32 %v1908_v51, %v908_v45 }
0x1723   :  { %932 = vrot.lane.b32.xlu2 %v911_v7, %s1793_s15  ;;  %v1582_v9 = vmul.f32 -1.442695, %v911_v7 }
0x1725   :  { %1682 = vpow2.f32 %v1582_v9 }
0x1726   :  { %v909_v8 = vpop.f32.mrf.mxu3 }
0x172b   :  { %v1683_v11 = vpop.eup %1682 }
0x172c   :  { %v915_v12 = vadd.f32 1.0, %v1683_v11 }
0x172e   :  { %1684 = vrcp.f32 %v915_v12  ;;  %v927_v38 = vand.u32 2147483648, %v915_v12  ;;  %vm921_vm5 = vweird.f32 %v915_v12  ;;  %v925_v18 = vand.u32 2147483647, %v915_v12 }
0x1730   :  { %v928_v51 = vor.u32 1.1754944e-38, %v927_v38  ;;  %vm926_vm7 = vcmp.eq.f32.partialorder %v925_v18, 8.507059e+37  ;;  %v2141_v18 = vld [vmem:[%s2240_s3 + $0x1] ss:$0 sm:$0xff] }
0x1734   :  { %v1685_v13 = vpop.eup %1684 }
0x1735   :  { %v917_v3 = vmul.f32 %v1685_v13, %v915_v12  ;;  %vm922_vm4 = vweird.f32 %v1685_v13 }
0x1736   :  { %vm923_vm6 = vmor %vm921_vm5, %vm922_vm4 }
0x1737   :  { %v918_v14 = vsub.f32 1.0, %v917_v3 }
0x1739   :  { %v919_v35 = vmul.f32 %v1685_v13, %v918_v14  ;;  %v1727_v14 = vld [vmem:[%s2238_s1] sm:$0xff] }
0x173b   :  { %v920_v17 = vadd.f32 %v1685_v13, %v919_v35  ;;  %v1728_v35 = vld [vmem:[#allocation7 + $0x8] sm:$0xff] }
0x173d   :  { %v924_v19 = vsel %vm923_vm6, %v1685_v13, %v920_v17 }
0x173e   :  { %v929_v24 = vsel %vm926_vm7, %v928_v51, %v924_v19 }
0x173f   :  { %v942_v30 = vsub.f32 1.0, %v929_v24  ;;  %v948_v31 = vmul.f32 %v929_v24, %v2056_v20  ;;  %v1725_v20 = vld [vmem:[%s2238_s1 + $0x8] sm:$0xff] }
0x177d   :  { %v933_v23 = vpop.permute.xlu2 %932 }
0x177e   :  { %v935_v61 = vmul.f32 %v933_v23, %v929_v24 }
0x1780   :  { %937 = vrot.lane.b32.xlu0 %v935_v61, %s1790_s7 }
0x17f2   :  { %v938_v0 = vpop.permute.xlu0 %937 }
0x17f3   :  { %v940_v28 = vadd.f32 %v938_v0, %v911_v7 }
0x17f5   :  { %1686 = vtanh.f32 %v940_v28 }
0x17fb   :  { %v1687_v29 = vpop.eup %1686 }
0x17fc   :  { %944 = vrot.lane.b32.xlu1 %v1687_v29, %s1794_s16 }
0x186e   :  { %v945_v1 = vpop.permute.xlu1 %944 }
0x186f   :  { %v947_v2 = vmul.f32 %v945_v1, %v942_v30 }
0x1871   :  { %v2095_v32 = vadd.f32 %v948_v31, %v947_v2 }
0x1873   :  { %v950_v33 = vpack.c.bf16 %v2095_v32, %v2095_v32 }
0x1875   :  { %952 = vrot.lane.b32.xlu2 %v950_v33, %s1794_s16 }
0x18cf   :  { %v953_v37 = vpop.permute.xlu2 %952 }
0x18d0   :  { %1583 = vmatmul.msk.bf16.vlgmr.msra.gmra.mxu1 %vm107_vm2, %v953_v37  ;;  %1587 = vmatmul.msk.bf16.vlgmr.msra.gmra.mxu3 %vm107_vm2, %v953_v37 }
0x18d1   :  { %1207 = vmatpush.bf16.msra.mxu1 %v1877_v34  ;;  %1299 = vmatpush.bf16.msra.mxu3 %v1724_v39 }
0x18d5   :  { %1208 = vmatpush.bf16.msra.mxu1 %v1882_v36  ;;  %1300 = vmatpush.bf16.msra.mxu3 %v1725_v20 }
0x194d   :  { %v966_v40 = vpop.f32.mrf.mxu1 }
0x194e   :  { %v2111_v41 = vadd.f32 %v1947_v25, %v966_v40 }
0x1950   :  { %v970_v42 = vpack.c.bf16 %v2111_v41, %v2111_v41 }
0x1952   :  { %1585 = vmatmul.msk.bf16.vlgmr.msra.gmra.mxu2 %vm130_vm3, %v970_v42 }
0x1953   :  { %v1049_v34 = vpop.f32.mrf.mxu3  ;;  %1285 = vmatpush.bf16.msra.mxu2 %v1918_v15 }
0x1955   :  { %v968_v44 = vpop.f32.mrf.mxu1 }
0x1957   :  { %1286 = vmatpush.bf16.msra.mxu2 %v1924_v16 }
0x195b   :  { %v1051_v36 = vpop.f32.mrf.mxu3 }
0x19d5   :  { %v996_v22 = vpop.f32.mrf.mxu2 }
0x19d6   :  { %v997_v47 = vadd.f32 %v996_v22, %v980_v46 }
0x19d8   :  { %v1000_v21 = vadd.f32 %v2121_v49, %v997_v47 }
0x19da   :  { %1021 = vrot.lane.b32.xlu0 %v1000_v21, %s1793_s15  ;;  %v1586_v52 = vmul.f32 -1.442695, %v1000_v21 }
0x19dc   :  { %1688 = vpow2.f32 %v1586_v52 }
0x19dd   :  { %v998_v10 = vpop.f32.mrf.mxu2 }
0x19e2   :  { %v1689_v50 = vpop.eup %1688 }
0x19e3   :  { %v1004_v15 = vadd.f32 1.0, %v1689_v50 }
0x19e5   :  { %1690 = vrcp.f32 %v1004_v15  ;;  %v1016_v57 = vand.u32 2147483648, %v1004_v15  ;;  %vm1010_vm9 = vweird.f32 %v1004_v15  ;;  %v1014_v58 = vand.u32 2147483647, %v1004_v15 }
0x19e7   :  { %v1017_v60 = vor.u32 1.1754944e-38, %v1016_v57  ;;  %vm1015_vm11 = vcmp.eq.f32.partialorder %v1014_v58, 8.507059e+37  ;;  %v1733_v58 = vld [vmem:[%s2241_s4 + $0x8] sm:$0xff] }
0x19eb   :  { %v1691_v53 = vpop.eup %1690 }
0x19ec   :  { %v1006_v16 = vmul.f32 %v1691_v53, %v1004_v15  ;;  %vm1011_vm8 = vweird.f32 %v1691_v53 }
0x19ed   :  { %vm1012_vm10 = vmor %vm1010_vm9, %vm1011_vm8 }
0x19ee   :  { %v1007_v54 = vsub.f32 1.0, %v1006_v16  ;;  %v1731_v16 = vld [vmem:[#allocation7 + $0x18] sm:$0xff] }
0x19f0   :  { %v1008_v55 = vmul.f32 %v1691_v53, %v1007_v54  ;;  %v1732_v54 = vld [vmem:[#allocation7 + $0x10] sm:$0xff] }
0x19f2   :  { %v1009_v56 = vadd.f32 %v1691_v53, %v1008_v55 }
0x19f4   :  { %v1013_v59 = vsel %vm1012_vm10, %v1691_v53, %v1009_v56 }
0x19f5   :  { %v1018_v4 = vsel %vm1015_vm11, %v1017_v60, %v1013_v59 }
0x19f6   :  { %v1031_v7 = vsub.f32 1.0, %v1018_v4  ;;  %v1037_v9 = vmul.f32 %v1018_v4, %v2080_v62  ;;  %v1729_v62 = vld [vmem:[#allocation7] sm:$0xff] }
0x1a4c   :  { %v1022_v63 = vpop.permute.xlu0 %1021 }
0x1a4d   :  { %v1024_v46 = vmul.f32 %v1022_v63, %v1018_v4  ;;  %v1734_v63 = vld [vmem:[%s2241_s4] sm:$0xff] }
0x1a4f   :  { %1026 = vrot.lane.b32.xlu1 %v1024_v46, %s1790_s7 }
0x1ac1   :  { %v1027_v43 = vpop.permute.xlu1 %1026 }
0x1ac2   :  { %v1029_v45 = vadd.f32 %v1027_v43, %v1000_v21 }
0x1ac4   :  { %1692 = vtanh.f32 %v1029_v45 }
0x1aca   :  { %v1693_v6 = vpop.eup %1692 }
0x1acb   :  { %1033 = vrot.lane.b32.xlu2 %v1693_v6, %s1794_s16 }
0x1b25   :  { %v1034_v8 = vpop.permute.xlu2 %1033 }
0x1b26   :  { %v1036_v11 = vmul.f32 %v1034_v8, %v1031_v7 }
0x1b28   :  { %v2128_v12 = vadd.f32 %v1037_v9, %v1036_v11 }
0x1b2a   :  { %v1039_v13 = vpack.c.bf16 %v2128_v12, %v2128_v12 }
0x1b2c   :  { %1054 = vrot.lane.b32.xlu0 %v1039_v13, %s1794_s16 }
0x1b9e   :  { %v1055_v3 = vpop.permute.xlu0 %1054 }
0x1b9f   :  { %1588 = vmatmul.msk.bf16.vlgmr.msrb.gmra.mxu1 %vm107_vm2, %v1055_v3  ;;  %1591 = vmatmul.msk.bf16.vlgmr.msrb.gmra.mxu2 %vm107_vm2, %v1055_v3 }
0x1ba0   :  { %1316 = vmatpush.bf16.msrb.mxu1 %v1727_v14  ;;  %1387 = vmatpush.bf16.msrb.mxu2 %v1728_v35 }
0x1ba4   :  { %1388 = vmatpush.bf16.msrb.mxu2 %v1729_v62 }
0x1c1c   :  { %v1068_v17 = vpop.f32.mrf.mxu1 }
0x1c1d   :  { %v1069_v38 = vadd.f32 %v1068_v17, %v1049_v34 }
0x1c1f   :  { %v1072_v19 = vadd.f32 %v2141_v18, %v1069_v38 }
0x1c21   :  { %1093 = vrot.lane.b32.xlu1 %v1072_v19, %s1793_s15  ;;  %v1589_v61 = vmul.f32 -1.442695, %v1072_v19 }
0x1c22   :  { %v1141_v51 = vpop.f32.mrf.mxu2 }
0x1c23   :  { %1694 = vpow2.f32 %v1589_v61 }
0x1c24   :  { %v1070_v23 = vpop.f32.mrf.mxu1 }
0x1c29   :  { %v1695_v0 = vpop.eup %1694 }
0x1c2a   :  { %v1143_v24 = vpop.f32.mrf.mxu2  ;;  %v1076_v28 = vadd.f32 1.0, %v1695_v0 }
0x1c2c   :  { %1696 = vrcp.f32 %v1076_v28  ;;  %v1088_v33 = vand.u32 2147483648, %v1076_v28  ;;  %vm1082_vm13 = vweird.f32 %v1076_v28  ;;  %v1086_v37 = vand.u32 2147483647, %v1076_v28 }
0x1c2e   :  { %v1089_v20 = vor.u32 1.1754944e-38, %v1088_v33  ;;  %vm1087_vm15 = vcmp.eq.f32.partialorder %v1086_v37, 8.507059e+37 }
0x1c32   :  { %v1697_v29 = vpop.eup %1696 }
0x1c33   :  { %v1078_v30 = vmul.f32 %v1697_v29, %v1076_v28  ;;  %vm1083_vm12 = vweird.f32 %v1697_v29 }
0x1c34   :  { %vm1084_vm14 = vmor %vm1082_vm13, %vm1083_vm12 }
0x1c35   :  { %v1079_v1 = vsub.f32 1.0, %v1078_v30 }
0x1c37   :  { %v1080_v31 = vmul.f32 %v1697_v29, %v1079_v1 }
0x1c39   :  { %v1081_v2 = vadd.f32 %v1697_v29, %v1080_v31 }
0x1c3b   :  { %v1085_v39 = vsel %vm1084_vm14, %v1697_v29, %v1081_v2 }
0x1c3c   :  { %v1090_v42 = vsel %vm1087_vm15, %v1089_v20, %v1085_v39 }
0x1c3d   :  { %v1103_v47 = vsub.f32 1.0, %v1090_v42  ;;  %v1109_v10 = vmul.f32 %v1090_v42, %v2095_v32 }
0x1c93   :  { %v1094_v40 = vpop.permute.xlu1 %1093 }
0x1c94   :  { %v1096_v34 = vmul.f32 %v1094_v40, %v1090_v42 }
0x1c96   :  { %1098 = vrot.lane.b32.xlu2 %v1096_v34, %s1790_s7 }
0x1cf0   :  { %v1099_v44 = vpop.permute.xlu2 %1098 }
0x1cf1   :  { %v1101_v36 = vadd.f32 %v1099_v44, %v1072_v19 }
0x1cf3   :  { %1698 = vtanh.f32 %v1101_v36 }
0x1cf9   :  { %v1699_v22 = vpop.eup %1698 }
0x1cfa   :  { %1105 = vrot.lane.b32.xlu0 %v1699_v22, %s1794_s16 }
0x1d6c   :  { %v1106_v21 = vpop.permute.xlu0 %1105 }
0x1d6d   :  { %v1108_v52 = vmul.f32 %v1106_v21, %v1103_v47 }
0x1d6f   :  { %v2148_v50 = vadd.f32 %v1109_v10, %v1108_v52 }
0x1d71   :  { %v1111_v15 = vpack.c.bf16 %v2148_v50, %v2148_v50 }
0x1d73   :  { %1113 = vrot.lane.b32.xlu1 %v1111_v15, %s1794_s16 }
0x1de5   :  { %v1114_v53 = vpop.permute.xlu1 %1113 }
0x1de6   :  { %1590 = vmatmul.msk.bf16.vlgmr.msrb.gmra.mxu0 %vm107_vm2, %v1114_v53  ;;  %1594 = vmatmul.msk.bf16.vlgmr.msra.gmra.mxu1 %vm107_vm2, %v1114_v53 }
0x1de7   :  { %1368 = vmatpush.bf16.msrb.mxu0 %v1731_v16 }
0x1deb   :  { %1369 = vmatpush.bf16.msrb.mxu0 %v1732_v54 }
0x1e63   :  { %v1127_v55 = vpop.f32.mrf.mxu0  ;;  %v1210_v56 = vpop.f32.mrf.mxu1 }
0x1e64   :  { %v2156_v32 = vadd.f32 %v1947_v25, %v1127_v55 }
0x1e66   :  { %v1131_v57 = vpack.c.bf16 %v2156_v32, %v2156_v32 }
0x1e68   :  { %1592 = vmatmul.msk.bf16.vlgmr.msrb.gmra.mxu3 %vm130_vm3, %v1131_v57 }
0x1e69   :  { %1446 = vmatpush.bf16.msrb.mxu3 %v1733_v58 }
0x1e6b   :  { %v1129_v59 = vpop.f32.mrf.mxu0  ;;  %v1212_v60 = vpop.f32.mrf.mxu1 }
0x1e6d   :  { %1447 = vmatpush.bf16.msrb.mxu3 %v1734_v63 }
0x1eeb   :  { %v1157_v4 = vpop.f32.mrf.mxu3 }
0x1eec   :  { %v1158_v25 = vadd.f32 %v1157_v4, %v1141_v51 }
0x1eee   :  { %v1161_v46 = vadd.f32 %v2121_v49, %v1158_v25 }
0x1ef0   :  { %1182 = vrot.lane.b32.xlu2 %v1161_v46, %s1793_s15  ;;  %v1593_v45 = vmul.f32 -1.442695, %v1161_v46 }
0x1ef2   :  { %1700 = vpow2.f32 %v1593_v45 }
0x1ef3   :  { %v1159_v43 = vpop.f32.mrf.mxu3 }
0x1ef8   :  { %v1701_v6 = vpop.eup %1700 }
0x1ef9   :  { %v1165_v7 = vadd.f32 1.0, %v1701_v6 }
0x1efb   :  { %1702 = vrcp.f32 %v1165_v7  ;;  %v1177_v14 = vand.u32 2147483648, %v1165_v7  ;;  %vm1171_vm5 = vweird.f32 %v1165_v7  ;;  %v1175_v35 = vand.u32 2147483647, %v1165_v7 }
0x1efd   :  { %v1178_v17 = vor.u32 1.1754944e-38, %v1177_v14  ;;  %vm1176_vm7 = vcmp.eq.f32.partialorder %v1175_v35, 8.507059e+37 }
0x1f01   :  { %v1703_v8 = vpop.eup %1702 }
0x1f02   :  { %v1167_v9 = vmul.f32 %v1703_v8, %v1165_v7  ;;  %vm1172_vm4 = vweird.f32 %v1703_v8 }
0x1f03   :  { %vm1173_vm6 = vmor %vm1171_vm5, %vm1172_vm4 }
0x1f04   :  { %v1168_v11 = vsub.f32 1.0, %v1167_v9 }
0x1f06   :  { %v1169_v13 = vmul.f32 %v1703_v8, %v1168_v11 }
0x1f08   :  { %v1170_v3 = vadd.f32 %v1703_v8, %v1169_v13 }
0x1f0a   :  { %v1174_v62 = vsel %vm1173_vm6, %v1703_v8, %v1170_v3  ;;  %v2194_v8 = vld [vmem:[%s2242_s5] ss:$0 sm:$0xff]  ;;  %s1795_s5 = smov 16  }
0x1f0b   :  { %v1179_v19 = vsel %vm1176_vm7, %v1178_v17, %v1174_v62 }
0x1f0c   :  { %v1192_v0 = vsub.f32 1.0, %v1179_v19  ;;  %v1198_v29 = vmul.f32 %v1179_v19, %v2128_v12 }
0x1f4a   :  { %v1183_v38 = vpop.permute.xlu2 %1182 }
0x1f4b   :  { %v1185_v51 = vmul.f32 %v1183_v38, %v1179_v19 }
0x1f4d   :  { %1187 = vrot.lane.b32.xlu0 %v1185_v51, %s1790_s7 }
0x1fbf   :  { %v1188_v23 = vpop.permute.xlu0 %1187 }
0x1fc0   :  { %v1190_v24 = vadd.f32 %v1188_v23, %v1161_v46 }
0x1fc2   :  { %1704 = vtanh.f32 %v1190_v24 }
0x1fc8   :  { %v1705_v61 = vpop.eup %1704 }
0x1fc9   :  { %1194 = vrot.lane.b32.xlu1 %v1705_v61, %s1794_s16 }
0x203b   :  { %v1195_v28 = vpop.permute.xlu1 %1194 }
0x203c   :  { %v1197_v30 = vmul.f32 %v1195_v28, %v1192_v0 }
0x203e   :  { %v2172_v1 = vadd.f32 %v1198_v29, %v1197_v30 }
0x2040   :  { %v1200_v31 = vpack.c.bf16 %v2172_v1, %v2172_v1 }
0x2042   :  { %1215 = vrot.lane.b32.xlu2 %v1200_v31, %s1794_s16 }
0x209c   :  { %v1216_v2 = vpop.permute.xlu2 %1215 }
0x209d   :  { %1595 = vmatmul.msk.bf16.vlgmr.msra.gmra.mxu0 %vm107_vm2, %v1216_v2  ;;  %1598 = vmatmul.msk.bf16.vlgmr.msra.gmra.mxu3 %vm107_vm2, %v1216_v2 }
0x211a   :  { %v1229_v33 = vpop.f32.mrf.mxu0 }
0x211b   :  { %v1230_v37 = vadd.f32 %v1229_v33, %v1210_v56 }
0x211d   :  { %v1233_v39 = vadd.f32 %v2141_v18, %v1230_v37 }
0x211f   :  { %1254 = vrot.lane.b32.xlu0 %v1233_v39, %s1793_s15  ;;  %v1596_v42 = vmul.f32 -1.442695, %v1233_v39 }
0x2120   :  { %v1302_v12 = vpop.f32.mrf.mxu3 }
0x2121   :  { %1706 = vpow2.f32 %v1596_v42 }
0x2122   :  { %v1231_v20 = vpop.f32.mrf.mxu0 }
0x2127   :  { %v1707_v34 = vpop.eup %1706 }
0x2128   :  { %v1304_v40 = vpop.f32.mrf.mxu3  ;;  %v1237_v44 = vadd.f32 1.0, %v1707_v34 }
0x212a   :  { %1708 = vrcp.f32 %v1237_v44  ;;  %v1249_v52 = vand.u32 2147483648, %v1237_v44  ;;  %vm1243_vm9 = vweird.f32 %v1237_v44  ;;  %v1247_v15 = vand.u32 2147483647, %v1237_v44 }
0x212c   :  { %v1250_v16 = vor.u32 1.1754944e-38, %v1249_v52  ;;  %vm1248_vm11 = vcmp.eq.f32.partialorder %v1247_v15, 8.507059e+37 }
0x2130   :  { %v1709_v36 = vpop.eup %1708 }
0x2131   :  { %v1239_v22 = vmul.f32 %v1709_v36, %v1237_v44  ;;  %vm1244_vm8 = vweird.f32 %v1709_v36 }
0x2132   :  { %vm1245_vm10 = vmor %vm1243_vm9, %vm1244_vm8  ;;  %vm1483_vm8 = vcmask 392192   ;;  %vm1485_vm9 = vcmask 523264  }
0x2133   :  { %v1240_v47 = vsub.f32 1.0, %v1239_v22 }
0x2135   :  { %v1241_v21 = vmul.f32 %v1709_v36, %v1240_v47 }
0x2137   :  { %v1242_v10 = vadd.f32 %v1709_v36, %v1241_v21 }
0x2139   :  { %v1246_v53 = vsel %vm1245_vm10, %v1709_v36, %v1242_v10  ;;  %vm1487_vm10 = vcmask 654336  }
0x213a   :  { %v1251_v55 = vsel %vm1248_vm11, %v1250_v16, %v1246_v53  ;;  %vm1489_vm11 = vcmask 785408  }
0x213b   :  { %v1264_v60 = vsub.f32 1.0, %v1251_v55  ;;  %v1270_v4 = vmul.f32 %v1251_v55, %v2148_v50 }
0x2191   :  { %v1255_v54 = vpop.permute.xlu0 %1254 }
0x2192   :  { %v1257_v56 = vmul.f32 %v1255_v54, %v1251_v55 }
0x2194   :  { %1259 = vrot.lane.b32.xlu1 %v1257_v56, %s1790_s7 }
0x2206   :  { %v1260_v57 = vpop.permute.xlu1 %1259 }
0x2207   :  { %v1262_v58 = vadd.f32 %v1260_v57, %v1233_v39 }
0x2209   :  { %1710 = vtanh.f32 %v1262_v58 }
0x220f   :  { %v1711_v59 = vpop.eup %1710 }
0x2210   :  { %1266 = vrot.lane.b32.xlu2 %v1711_v59, %s1794_s16 }
0x226a   :  { %v1267_v63 = vpop.permute.xlu2 %1266 }
0x226b   :  { %v1269_v25 = vmul.f32 %v1267_v63, %v1264_v60 }
0x226d   :  { %v2184_v46 = vadd.f32 %v1270_v4, %v1269_v25 }
0x226f   :  { %v1272_v43 = vpack.c.bf16 %v2184_v46, %v2184_v46 }
0x2271   :  { %1274 = vrot.lane.b32.xlu0 %v1272_v43, %s1794_s16 }
0x22e3   :  { %v1275_v45 = vpop.permute.xlu0 %1274 }
0x22e4   :  { %1597 = vmatmul.msk.bf16.vlgmr.msra.gmra.mxu2 %vm107_vm2, %v1275_v45  ;;  %1601 = vmatmul.msk.bf16.vlgmr.msrb.gmra.mxu0 %vm107_vm2, %v1275_v45 }
0x2361   :  { %v1371_v6 = vpop.f32.mrf.mxu0 }
0x2367   :  { %v1288_v7 = vpop.f32.mrf.mxu2 }
0x2368   :  { %v2197_v50 = vadd.f32 %v2194_v8, %v1288_v7 }
0x2369   :  { %v1373_v9 = vpop.f32.mrf.mxu0 }
0x236a   :  { %v1292_v11 = vpack.c.bf16 %v2197_v50, %v2197_v50 }
0x236c   :  { %1599 = vmatmul.msk.bf16.vlgmr.msrb.gmra.mxu1 %vm130_vm3, %v1292_v11 }
0x236f   :  { %v1290_v13 = vpop.f32.mrf.mxu2 }
0x23e9   :  { %v1318_v3 = vpop.f32.mrf.mxu1 }
0x23ea   :  { %v1319_v14 = vadd.f32 %v1318_v3, %v1302_v12 }
0x23ec   :  { %v1322_v35 = vadd.f32 %v2121_v49, %v1319_v14 }
0x23ee   :  { %1343 = vrot.lane.b32.xlu1 %v1322_v35, %s1793_s15  ;;  %v1600_v17 = vmul.f32 -1.442695, %v1322_v35 }
0x23f0   :  { %1712 = vpow2.f32 %v1600_v17 }
0x23f1   :  { %v1320_v62 = vpop.f32.mrf.mxu1 }
0x23f6   :  { %v1713_v38 = vpop.eup %1712 }
0x23f7   :  { %v1326_v19 = vadd.f32 1.0, %v1713_v38 }
0x23f9   :  { %1714 = vrcp.f32 %v1326_v19  ;;  %v1338_v28 = vand.u32 2147483648, %v1326_v19  ;;  %vm1332_vm13 = vweird.f32 %v1326_v19  ;;  %v1336_v29 = vand.u32 2147483647, %v1326_v19 }
0x23fb   :  { %v1339_v49 = vor.u32 1.1754944e-38, %v1338_v28  ;;  %vm1337_vm15 = vcmp.eq.f32.partialorder %v1336_v29, 8.507059e+37 }
0x23ff   :  { %v1715_v51 = vpop.eup %1714 }
0x2400   :  { %v1328_v23 = vmul.f32 %v1715_v51, %v1326_v19  ;;  %vm1333_vm12 = vweird.f32 %v1715_v51 }
0x2401   :  { %vm1334_vm14 = vmor %vm1332_vm13, %vm1333_vm12 }
0x2402   :  { %v1329_v24 = vsub.f32 1.0, %v1328_v23 }
0x2404   :  { %v1330_v61 = vmul.f32 %v1715_v51, %v1329_v24 }
0x2406   :  { %v1331_v0 = vadd.f32 %v1715_v51, %v1330_v61 }
0x2408   :  { %v1335_v30 = vsel %vm1334_vm14, %v1715_v51, %v1331_v0 }
0x2409   :  { %v1340_v2 = vsel %vm1337_vm15, %v1339_v49, %v1335_v30 }
0x240a   :  { %v1353_v20 = vsub.f32 1.0, %v1340_v2  ;;  %v1359_v42 = vmul.f32 %v1340_v2, %v2172_v1 }
0x2460   :  { %v1344_v31 = vpop.permute.xlu1 %1343 }
0x2461   :  { %v1346_v33 = vmul.f32 %v1344_v31, %v1340_v2 }
0x2463   :  { %1348 = vrot.lane.b32.xlu2 %v1346_v33, %s1790_s7 }
0x24bd   :  { %v1349_v37 = vpop.permute.xlu2 %1348 }
0x24be   :  { %v1351_v39 = vadd.f32 %v1349_v37, %v1322_v35 }
0x24c0   :  { %1716 = vtanh.f32 %v1351_v39 }
0x24c6   :  { %v1717_v12 = vpop.eup %1716 }
0x24c7   :  { %1355 = vrot.lane.b32.xlu0 %v1717_v12, %s1794_s16 }
0x2539   :  { %v1356_v40 = vpop.permute.xlu0 %1355 }
0x253a   :  { %v1358_v34 = vmul.f32 %v1356_v40, %v1353_v20 }
0x253c   :  { %v1360_v44 = vadd.f32 %v1359_v42, %v1358_v34 }
0x253e   :  { %v1361_v36 = vpack.c.bf16 %v1360_v44, %v1360_v44 }
0x2540   :  { %1376 = vrot.lane.b32.xlu1 %v1361_v36, %s1794_s16 }
0x25b2   :  { %v1377_v22 = vpop.permute.xlu1 %1376 }
0x25b3   :  { %1602 = vmatmul.msk.bf16.vlgmr.msrb.gmra.mxu2 %vm107_vm2, %v1377_v22 }
0x2636   :  { %v1390_v47 = vpop.f32.mrf.mxu2 }
0x2637   :  { %v1391_v21 = vadd.f32 %v1390_v47, %v1371_v6 }
0x2639   :  { %v1394_v10 = vadd.f32 %v2141_v18, %v1391_v21 }
0x263b   :  { %1415 = vrot.lane.b32.xlu2 %v1394_v10, %s1793_s15  ;;  %v1603_v15 = vmul.f32 -1.442695, %v1394_v10 }
0x263d   :  { %1718 = vpow2.f32 %v1603_v15 }
0x263e   :  { %v1392_v52 = vpop.f32.mrf.mxu2 }
0x2643   :  { %v1719_v53 = vpop.eup %1718 }
0x2644   :  { %v1398_v16 = vadd.f32 1.0, %v1719_v53 }
0x2646   :  { %1720 = vrcp.f32 %v1398_v16  ;;  %v1410_v58 = vand.u32 2147483648, %v1398_v16  ;;  %vm1404_vm5 = vweird.f32 %v1398_v16  ;;  %v1408_v59 = vand.u32 2147483647, %v1398_v16 }
0x2648   :  { %v1411_v18 = vor.u32 1.1754944e-38, %v1410_v58  ;;  %vm1409_vm7 = vcmp.eq.f32.partialorder %v1408_v59, 8.507059e+37 }
0x264c   :  { %v1721_v1 = vpop.eup %1720 }
0x264d   :  { %v1400_v54 = vmul.f32 %v1721_v1, %v1398_v16  ;;  %vm1405_vm4 = vweird.f32 %v1721_v1 }
0x264e   :  { %vm1406_vm6 = vmor %vm1404_vm5, %vm1405_vm4 }
0x264f   :  { %v1401_v55 = vsub.f32 1.0, %v1400_v54 }
0x2651   :  { %v1402_v56 = vmul.f32 %v1721_v1, %v1401_v55 }
0x2653   :  { %v1403_v57 = vadd.f32 %v1721_v1, %v1402_v56 }
0x2655   :  { %v1407_v60 = vsel %vm1406_vm6, %v1721_v1, %v1403_v57 }
0x2656   :  { %v1412_v4 = vsel %vm1409_vm7, %v1411_v18, %v1407_v60 }
0x2657   :  { %v1425_v7 = vsub.f32 1.0, %v1412_v4 }
0x2695   :  { %v1416_v63 = vpop.permute.xlu2 %1415 }
0x2696   :  { %v1418_v25 = vmul.f32 %v1416_v63, %v1412_v4 }
0x2698   :  { %1420 = vrot.lane.b32.xlu0 %v1418_v25, %s1790_s7 }
0x26a0   :  { %1454 = vrot.lane.b32.xlu0 %v1990_v48, %s1795_s5  ;;  %v1431_v48 = vmul.f32 %v1412_v4, %v2184_v46 }
0x26a8   :  { %1466 = vrot.lane.b32.xlu0 %v2111_v41, %s1790_s7  ;;  %s1797_s7 = smov 48  }
0x270a   :  { %v1421_v43 = vpop.permute.xlu0 %1420 }
0x270b   :  { %v1423_v45 = vadd.f32 %v1421_v43, %v1394_v10 }
0x270d   :  { %1722 = vtanh.f32 %v1423_v45 }
0x2712   :  { %v1455_v46 = vpop.permute.xlu0 %1454 }
0x2713   :  { %v1723_v6 = vpop.eup %1722  ;;  %v1481_v35 = vsel %vm130_vm3, %v1950_v27, %v1455_v46 }
0x2714   :  { %1427 = vrot.lane.b32.xlu1 %v1723_v6, %s1794_s16 }
0x271a   :  { %v1467_v38 = vpop.permute.xlu0 %1466 }
0x271c   :  { %1458 = vrot.lane.b32.xlu1 %v2029_v5, %s1793_s15 }
0x2724   :  { %1470 = vrot.lane.b32.xlu1 %v2156_v32, %s1796_s13 }
0x272c   :  { %1497 = vrot.lane.b32.xlu1 %v1360_v44, %s1794_s16 }
0x2786   :  { %v1428_v9 = vpop.permute.xlu1 %1427 }
0x2787   :  { %v1430_v11 = vmul.f32 %v1428_v9, %v1425_v7 }
0x2789   :  { %v1432_v41 = vadd.f32 %v1431_v48, %v1430_v11 }
0x278b   :  { %v1433_v13 = vpack.c.bf16 %v1432_v41, %v1432_v41 }
0x278d   :  { %1435 = vrot.lane.b32.xlu2 %v1433_v13, %s1794_s16 }
0x278e   :  { %v1459_v3 = vpop.permute.xlu1 %1458 }
0x278f   :  { %v1482_v62 = vsel %vm107_vm2, %v1481_v35, %v1459_v3 }
0x2795   :  { %1462 = vrot.lane.b32.xlu2 %v2068_v26, %s1797_s7 }
0x2796   :  { %v1471_v14 = vpop.permute.xlu1 %1470 }
0x279d   :  { %1474 = vrot.lane.b32.xlu2 %v2197_v50, %s1794_s16 }
0x279e   :  { %v1498_v5 = vpop.permute.xlu1 %1497 }
0x279f   :  { %1501 = vst.msk [vmem:[#allocation2] sm:$0x3] %vm58_vm0, %v1498_v5 }
0x27a5   :  { %1503 = vrot.lane.b32.xlu2 %v1432_v41, %s1794_s16 }
0x27e7   :  { %v1436_v32 = vpop.permute.xlu2 %1435 }
0x27e8   :  { %1604 = vmatmul.msk.bf16.vlgmr.msrb.gmra.mxu3 %vm107_vm2, %v1436_v32  ;;  %vm1491_vm2 = vcmask 916480  }
0x27ef   :  { %v1463_v26 = vpop.permute.xlu2 %1462 }
0x27f0   :  { %v1484_v17 = vsel %vm1483_vm8, %v1482_v62, %v1463_v26 }
0x27f1   :  { %v1486_v50 = vsel %vm1485_vm9, %v1484_v17, %v1467_v38 }
0x27f2   :  { %v1488_v51 = vsel %vm1487_vm10, %v1486_v50, %v1471_v14 }
0x27f7   :  { %v1475_v19 = vpop.permute.xlu2 %1474 }
0x27f8   :  { %v1490_v23 = vsel %vm1489_vm11, %v1488_v51, %v1475_v19 }
0x27ff   :  { %v1504_v24 = vpop.permute.xlu2 %1503 }
0x2800   :  { %1506 = vst.msk [vmem:[#allocation3] sm:$0x3] %vm58_vm0, %v1504_v24 }
0x286b   :  { %v1449_v61 = vpop.f32.mrf.mxu3 }
0x286c   :  { %v1450_v0 = vadd.f32 %v2194_v8, %v1449_v61 }
0x286e   :  { %1495 = vst.msk [vmem:[#allocation4] sm:$0x3] %vm62_vm1, %v1450_v0  ;;  %1478 = vrot.lane.b32.xlu0 %v1450_v0, %s1798_s14 }
0x2873   :  { %v1451_v27 = vpop.f32.mrf.mxu3 }
0x28e0   :  { %v1479_v28 = vpop.permute.xlu0 %1478 }
0x28e1   :  { %v1492_v29 = vsel %vm1491_vm2, %v1490_v23, %v1479_v28 }
0x28e2   :  { %1493 = vst [vmem:[%s2243_s6] sm:$0x3] %v1492_v29 }
0x28e3   :  { %1511 = vsyncpa [#allocation6], 1 }
0x28e4   :  { %1512 = vsyncpa [#allocation8], 1 }

</bundles_post_ra>
